<compile_context>
chip_gen: v5e
topology: v5e:2x2
jax: 0.10.0
libtpu: 0.0.40
codegen_flags: <defaults>
</compile_context>

<pallas_src>
import functools

import jax
import jax.numpy as jnp
from jax.experimental import pallas as pl
from jax.experimental.pallas import tpu as pltpu


# ----------------------------- fused kernel ---------------------------------

def _bottleneck_kernel(x_ref, w1_ref, w2_ref, w3_ref,
                       b1_ref, b2_ref, b3_ref, o_ref, *, H, W):
    """One grid step: Bslab independent (n, d) slabs, all three convs fused.

    x_ref : (Bslab, H, W, C)   input / residual block (input dtype)
    w1_ref: (C, mid)      bf16 conv1 weight, bn1 scale folded
    w2_ref: (9*mid, mid)  bf16 conv2 weight, K-concatenated (kh, kw, cin), bn2 scale folded
    w3_ref: (mid, C)      bf16 conv3 weight, bn3 scale folded
    b*_ref: (1, mid/C)    f32  bn biases
    o_ref : (Bslab, H, W, C)   output block
    """
    B = x_ref.shape[0]
    C = x_ref.shape[3]
    mid = w1_ref.shape[1]
    rows = B * H * W

    x = x_ref[...]
    x2 = x.reshape(rows, C)

    # ---- conv1 (1x1x1, bn1 scale pre-folded) + bias + relu ------------------
    h1 = jnp.dot(x2.astype(jnp.bfloat16), w1_ref[...],
                 preferred_element_type=jnp.float32)
    h1 = jnp.maximum(h1 + b1_ref[...], 0.0)          # (rows, mid) f32
    h1r = h1.reshape(B, H, W, mid)

    # ---- conv2 (1,3,3), stride 1, padding (0,1,1): one K=9*mid matmul -------
    # Build the im2col operand (rows, 9*mid) from shifted views of h1r.
    # W-direction shifts (minor axis) via small concats with a zero column;
    # H-direction shifts are pure leading-dim concats (cheap).
    zw = jnp.zeros((B, H, 1, mid), jnp.float32)
    kw_cat = jnp.concatenate(
        [jnp.concatenate([zw, h1r[:, :, :W - 1, :]], axis=2),   # reads w-1 (kw=0)
         h1r,                                                   # reads w   (kw=1)
         jnp.concatenate([h1r[:, :, 1:, :], zw], axis=2)],      # reads w+1 (kw=2)
        axis=-1)                                                # (B, H, W, 3*mid)
    zh = jnp.zeros((B, 1, W, 3 * mid), jnp.float32)
    k_op = jnp.concatenate(
        [jnp.concatenate([zh, kw_cat[:, :H - 1]], axis=1).reshape(rows, 3 * mid),  # kh=0
         kw_cat.reshape(rows, 3 * mid),                                            # kh=1
         jnp.concatenate([kw_cat[:, 1:], zh], axis=1).reshape(rows, 3 * mid)],     # kh=2
        axis=-1)                                                # (rows, 9*mid) f32

    h2 = jnp.dot(k_op.astype(jnp.bfloat16), w2_ref[...],
                 preferred_element_type=jnp.float32)
    h2 = jnp.maximum(h2 + b2_ref[...], 0.0)          # (rows, mid) f32

    # ---- conv3 (1x1x1, bn3 scale folded) + bias + residual + relu -----------
    y = jnp.dot(h2.astype(jnp.bfloat16), w3_ref[...],
                preferred_element_type=jnp.float32)
    y = y + b3_ref[...] + x2.astype(jnp.float32)
    o_ref[...] = jnp.maximum(y, 0.0).reshape(B, H, W, C).astype(o_ref.dtype)


# ----------------------------- wrapper ---------------------------------------

def _pick_bslab(nd, h, w, c, mid, vmem_budget_bytes=16 << 20, min_steps=4):
    """Largest divisor of nd whose per-step footprint fits the budget while
    keeping >= min_steps grid steps (when nd allows) so a 2-TensorCore chip
    still gets >= 2 pipelined steps per core."""
    def lane_pad(n):
        return ((n + 127) // 128) * 128

    # f32-equivalent bytes per (n, d) slab: double-buffered in/out blocks plus
    # the lane-padded in-kernel temporaries (h1, h2, im2col operand in f32 and
    # bf16, y, residual copy) that spill to VMEM.
    per_slab = 4 * h * w * (
        2 * c + 2 * c                      # x block + out block (double-buffered)
        + 2 * lane_pad(mid)                # h1 + h2 (f32, lane-padded 32->128)
        + lane_pad(9 * mid)                # f32 im2col operand
        + lane_pad(9 * mid) // 2           # bf16 copy of the operand
        + 2 * c                            # y (f32) + residual copy
    )
    cap = max(1, vmem_budget_bytes // per_slab)
    target = max(1, min(nd, cap))
    if nd >= min_steps:
        target = min(target, nd // min_steps)
    best = 1
    for d in range(1, target + 1):
        if nd % d == 0:
            best = d
    return best


def bottleneck3d_forward(x_ncdhw, p):
    """Full Bottleneck3d forward (stride=1, downsample=None), single fused kernel."""
    N, C, D, H, W = x_ncdhw.shape
    mid = p["w1"].shape[1]

    # Fold the BN per-output-channel scales into the conv weights (they commute
    # with the convolutions); cast weights to bf16 for native MXU throughput.
    w1 = (p["w1"] * p["s1"].reshape(1, mid)).astype(jnp.bfloat16)
    w2 = (p["w2"] * p["s2"].reshape(1, 1, 1, mid)).reshape(9 * mid, mid).astype(jnp.bfloat16)
    w3 = (p["w3"] * p["s3"].reshape(1, C)).astype(jnp.bfloat16)
    b1 = p["b1"].reshape(1, mid).astype(jnp.float32)
    b2 = p["b2"].reshape(1, mid).astype(jnp.float32)
    b3 = p["b3"].reshape(1, C).astype(jnp.float32)

    xl = jnp.transpose(x_ncdhw, (0, 2, 3, 4, 1)).reshape(N * D, H, W, C)
    ND = N * D
    bslab = _pick_bslab(ND, H, W, C, mid)

    out = pl.pallas_call(
        functools.partial(_bottleneck_kernel, H=H, W=W),
        out_shape=jax.ShapeDtypeStruct((ND, H, W, C), x_ncdhw.dtype),
        grid_spec=pltpu.PrefetchScalarGridSpec(
            num_scalar_prefetch=0,
            grid=(ND // bslab,),
            in_specs=[
                pl.BlockSpec((bslab, H, W, C), lambda i: (i, 0, 0, 0)),  # x
                pl.BlockSpec((C, mid), lambda i: (0, 0)),                # w1
                pl.BlockSpec((9 * mid, mid), lambda i: (0, 0)),          # w2 (K-concat)
                pl.BlockSpec((mid, C), lambda i: (0, 0)),                # w3
                pl.BlockSpec((1, mid), lambda i: (0, 0)),                # b1
                pl.BlockSpec((1, mid), lambda i: (0, 0)),                # b2
                pl.BlockSpec((1, C), lambda i: (0, 0)),                  # b3
            ],
            out_specs=pl.BlockSpec((bslab, H, W, C), lambda i: (i, 0, 0, 0)),
        ),
        compiler_params=pltpu.CompilerParams(
            dimension_semantics=("parallel",),
            vmem_limit_bytes=32 * 1024 * 1024),
    )(xl, w1, w2, w3, b1, b2, b3)

    return jnp.transpose(out.reshape(N, D, H, W, C), (0, 4, 1, 2, 3))


# ----------------------------- reference & setup ----------------------------

def fold_bn(gamma, beta, mean, var, eps=1e-5):
    scale = gamma / jnp.sqrt(var + eps)
    bias = beta - mean * scale
    return scale, bias


def reference_forward(x_ncdhw, p):
    """Pure-JAX f32 reference (same math as the PyTorch module, no Pallas)."""
    N, C, D, H, W = x_ncdhw.shape
    xl = jnp.transpose(x_ncdhw, (0, 2, 3, 4, 1))
    o = jnp.einsum("ndhwc,cm->ndhwm", xl, p["w1"]) * p["s1"] + p["b1"]
    o = jnp.maximum(o, 0.0)
    op = jnp.pad(o, ((0, 0), (0, 0), (1, 1), (1, 1), (0, 0)))
    acc = jnp.zeros_like(o)
    for kh in range(3):
        for kw in range(3):
            acc = acc + jnp.einsum("ndhwc,cm->ndhwm",
                                   op[:, :, kh:kh + H, kw:kw + W, :],
                                   p["w2"][kh, kw])
    o = jnp.maximum(acc * p["s2"] + p["b2"], 0.0)
    o = jnp.einsum("ndhwm,mc->ndhwc", o, p["w3"]) * p["s3"] + p["b3"]
    o = jnp.maximum(o + xl, 0.0)
    return jnp.transpose(o, (0, 4, 1, 2, 3))


if __name__ == "__main__":
    key = jax.random.PRNGKey(0)
    kx, k1, k2, k3 = jax.random.split(key, 4)

    # x: NCDHW, like nn.Conv3d input. C=128 keeps the lane axis dense.
    N, C, D, H, W = 2, 128, 8, 8, 8
    factor = 4
    mid = C // factor

    x = jax.random.normal(kx, (N, C, D, H, W), jnp.float32)

    # conv weights in channels-last matmul form:
    #   conv1: (Cin=C, Cout=mid); conv2: (kh, kw, Cin=mid, Cout=mid); conv3: (mid, C)
    w1 = 0.2 * jax.random.normal(k1, (C, mid), jnp.float32)
    w2 = 0.1 * jax.random.normal(k2, (3, 3, mid, mid), jnp.float32)
    w3 = 0.2 * jax.random.normal(k3, (mid, C), jnp.float32)

    def bn_params(n, seed):
        kk = jax.random.split(jax.random.PRNGKey(seed), 4)
        gamma = 1.0 + 0.1 * jax.random.normal(kk[0], (n,), jnp.float32)
        beta = 0.1 * jax.random.normal(kk[1], (n,), jnp.float32)
        mean = 0.1 * jax.random.normal(kk[2], (n,), jnp.float32)
        var = jnp.abs(1.0 + 0.1 * jax.random.normal(kk[3], (n,), jnp.float32))
        return fold_bn(gamma, beta, mean, var)

    s1, b1 = bn_params(mid, 1)
    s2, b2 = bn_params(mid, 2)
    s3, b3 = bn_params(C, 3)

    params = dict(w1=w1, w2=w2, w3=w3,
                  s1=s1, b1=b1, s2=s2, b2=b2, s3=s3, b3=b3)

    out = jax.block_until_ready(bottleneck3d_forward(x, params))
    ref = reference_forward(x, params)

    assert out.shape == x.shape
    # bf16 MXU operands (f32 accumulation) vs an all-f32 reference: compare at a
    # bf16-appropriate tolerance relative to the output scale.
    err = float(jnp.max(jnp.abs(out - ref)))
    scale = float(jnp.max(jnp.abs(ref)))
    assert err <= 2e-2 * scale + 1e-3, (
        f"Pallas output mismatch vs reference: max|err|={err:.5f}, scale={scale:.3f}")

    print("KERNEL_OK")
</pallas_src>

<mosaic_0001>
module attributes {stable_mosaic.version = 11 : i64} {
  func.func @_bottleneck_kernel(%arg0: i32, %arg1: memref<4x8x8x128xf32, #tpu.memory_space<vmem>>, %arg2: memref<128x32xbf16, #tpu.memory_space<vmem>>, %arg3: memref<288x32xbf16, #tpu.memory_space<vmem>>, %arg4: memref<32x128xbf16, #tpu.memory_space<vmem>>, %arg5: memref<1x32xf32, #tpu.memory_space<vmem>>, %arg6: memref<1x32xf32, #tpu.memory_space<vmem>>, %arg7: memref<1x128xf32, #tpu.memory_space<vmem>>, %arg8: memref<4x8x8x128xf32, #tpu.memory_space<vmem>>) attributes {dimension_semantics = [#tpu.dimension_semantics<parallel>], iteration_bounds = array<i64: 4>, scalar_prefetch = 0 : i64, scratch_operands = 0 : i64, tpu.core_type = #tpu.core_type<tc>, window_params = [{transform_indices = @transform_0, window_bounds = array<i64: 4, 8, 8, 128>}, {pipeline_mode = #tpu.pipeline_mode<synchronous>, transform_indices = @transform_1, window_bounds = array<i64: 128, 32>}, {pipeline_mode = #tpu.pipeline_mode<synchronous>, transform_indices = @transform_2, window_bounds = array<i64: 288, 32>}, {pipeline_mode = #tpu.pipeline_mode<synchronous>, transform_indices = @transform_3, window_bounds = array<i64: 32, 128>}, {pipeline_mode = #tpu.pipeline_mode<synchronous>, transform_indices = @transform_4, window_bounds = array<i64: 1, 32>}, {pipeline_mode = #tpu.pipeline_mode<synchronous>, transform_indices = @transform_5, window_bounds = array<i64: 1, 32>}, {pipeline_mode = #tpu.pipeline_mode<synchronous>, transform_indices = @transform_6, window_bounds = array<i64: 1, 128>}, {transform_indices = @transform_7, window_bounds = array<i64: 4, 8, 8, 128>}]} {
    %c0 = arith.constant 0 : index
    %c0_0 = arith.constant 0 : index
    %c0_1 = arith.constant 0 : index
    %c0_2 = arith.constant 0 : index
    %0 = vector.load %arg1[%c0, %c0_0, %c0_1, %c0_2] : memref<4x8x8x128xf32, #tpu.memory_space<vmem>>, vector<4x8x8x128xf32>
    %1 = vector.shape_cast %0 : vector<4x8x8x128xf32> to vector<256x128xf32>
    %2 = arith.truncf %1 : vector<256x128xf32> to vector<256x128xbf16>
    %c0_3 = arith.constant 0 : index
    %c0_4 = arith.constant 0 : index
    %3 = vector.load %arg2[%c0_3, %c0_4] : memref<128x32xbf16, #tpu.memory_space<vmem>>, vector<128x32xbf16>
    %cst = arith.constant dense<0.000000e+00> : vector<256x32xf32>
    %4 = tpu.matmul %2, %3, %cst {dimension_numbers = #tpu.dot_dimension_numbers<[1], [0], [0], [1], [0, 0, 1, 1], [], []>} : vector<256x128xbf16>, vector<128x32xbf16>, vector<256x32xf32> -> vector<256x32xf32>
    %c0_5 = arith.constant 0 : index
    %c0_6 = arith.constant 0 : index
    %5 = vector.load %arg5[%c0_5, %c0_6] : memref<1x32xf32, #tpu.memory_space<vmem>>, vector<1x32xf32>
    %6 = vector.broadcast %5 : vector<1x32xf32> to vector<256x32xf32>
    %7 = arith.addf %4, %6 : vector<256x32xf32>
    %cst_7 = arith.constant 0.000000e+00 : f32
    %8 = vector.broadcast %cst_7 : f32 to vector<256x32xf32>
    %9 = arith.maximumf %7, %8 : vector<256x32xf32>
    %10 = vector.shape_cast %9 : vector<256x32xf32> to vector<4x8x8x32xf32>
    %cst_8 = arith.constant 0.000000e+00 : f32
    %11 = vector.broadcast %cst_8 : f32 to vector<4x8x1x32xf32>
    %12 = vector.extract_strided_slice %10 {offsets = [0, 0, 0, 0], sizes = [4, 8, 7, 32], strides = [1, 1, 1, 1]} : vector<4x8x8x32xf32> to vector<4x8x7x32xf32>
    %13 = tpu.concatenate %11, %12 in 2 : vector<4x8x1x32xf32>, vector<4x8x7x32xf32> -> vector<4x8x8x32xf32>
    %14 = vector.extract_strided_slice %10 {offsets = [0, 0, 1, 0], sizes = [4, 8, 7, 32], strides = [1, 1, 1, 1]} : vector<4x8x8x32xf32> to vector<4x8x7x32xf32>
    %15 = tpu.concatenate %14, %11 in 2 : vector<4x8x7x32xf32>, vector<4x8x1x32xf32> -> vector<4x8x8x32xf32>
    %16 = tpu.concatenate %13, %10, %15 in 3 : vector<4x8x8x32xf32>, vector<4x8x8x32xf32>, vector<4x8x8x32xf32> -> vector<4x8x8x96xf32>
    %cst_9 = arith.constant 0.000000e+00 : f32
    %17 = vector.broadcast %cst_9 : f32 to vector<4x1x8x96xf32>
    %18 = vector.extract_strided_slice %16 {offsets = [0, 0, 0, 0], sizes = [4, 7, 8, 96], strides = [1, 1, 1, 1]} : vector<4x8x8x96xf32> to vector<4x7x8x96xf32>
    %19 = tpu.concatenate %17, %18 in 1 : vector<4x1x8x96xf32>, vector<4x7x8x96xf32> -> vector<4x8x8x96xf32>
    %20 = vector.shape_cast %19 : vector<4x8x8x96xf32> to vector<256x96xf32>
    %21 = vector.shape_cast %16 : vector<4x8x8x96xf32> to vector<256x96xf32>
    %22 = vector.extract_strided_slice %16 {offsets = [0, 1, 0, 0], sizes = [4, 7, 8, 96], strides = [1, 1, 1, 1]} : vector<4x8x8x96xf32> to vector<4x7x8x96xf32>
    %23 = tpu.concatenate %22, %17 in 1 : vector<4x7x8x96xf32>, vector<4x1x8x96xf32> -> vector<4x8x8x96xf32>
    %24 = vector.shape_cast %23 : vector<4x8x8x96xf32> to vector<256x96xf32>
    %25 = tpu.concatenate %20, %21, %24 in 1 : vector<256x96xf32>, vector<256x96xf32>, vector<256x96xf32> -> vector<256x288xf32>
    %26 = arith.truncf %25 : vector<256x288xf32> to vector<256x288xbf16>
    %c0_10 = arith.constant 0 : index
    %c0_11 = arith.constant 0 : index
    %27 = vector.load %arg3[%c0_10, %c0_11] : memref<288x32xbf16, #tpu.memory_space<vmem>>, vector<288x32xbf16>
    %cst_12 = arith.constant dense<0.000000e+00> : vector<256x32xf32>
    %28 = tpu.matmul %26, %27, %cst_12 {dimension_numbers = #tpu.dot_dimension_numbers<[1], [0], [0], [1], [0, 0, 1, 1], [], []>} : vector<256x288xbf16>, vector<288x32xbf16>, vector<256x32xf32> -> vector<256x32xf32>
    %c0_13 = arith.constant 0 : index
    %c0_14 = arith.constant 0 : index
    %29 = vector.load %arg6[%c0_13, %c0_14] : memref<1x32xf32, #tpu.memory_space<vmem>>, vector<1x32xf32>
    %30 = vector.broadcast %29 : vector<1x32xf32> to vector<256x32xf32>
    %31 = arith.addf %28, %30 : vector<256x32xf32>
    %cst_15 = arith.constant 0.000000e+00 : f32
    %32 = vector.broadcast %cst_15 : f32 to vector<256x32xf32>
    %33 = arith.maximumf %31, %32 : vector<256x32xf32>
    %34 = arith.truncf %33 : vector<256x32xf32> to vector<256x32xbf16>
    %c0_16 = arith.constant 0 : index
    %c0_17 = arith.constant 0 : index
    %35 = vector.load %arg4[%c0_16, %c0_17] : memref<32x128xbf16, #tpu.memory_space<vmem>>, vector<32x128xbf16>
    %cst_18 = arith.constant dense<0.000000e+00> : vector<256x128xf32>
    %36 = tpu.matmul %34, %35, %cst_18 {dimension_numbers = #tpu.dot_dimension_numbers<[1], [0], [0], [1], [0, 0, 1, 1], [], []>} : vector<256x32xbf16>, vector<32x128xbf16>, vector<256x128xf32> -> vector<256x128xf32>
    %c0_19 = arith.constant 0 : index
    %c0_20 = arith.constant 0 : index
    %37 = vector.load %arg7[%c0_19, %c0_20] : memref<1x128xf32, #tpu.memory_space<vmem>>, vector<1x128xf32>
    %38 = vector.broadcast %37 : vector<1x128xf32> to vector<256x128xf32>
    %39 = arith.addf %36, %38 : vector<256x128xf32>
    %40 = arith.addf %39, %1 : vector<256x128xf32>
    %cst_21 = arith.constant 0.000000e+00 : f32
    %41 = vector.broadcast %cst_21 : f32 to vector<256x128xf32>
    %42 = arith.maximumf %40, %41 : vector<256x128xf32>
    %43 = vector.shape_cast %42 : vector<256x128xf32> to vector<4x8x8x128xf32>
    %c0_22 = arith.constant 0 : index
    %c0_23 = arith.constant 0 : index
    %c0_24 = arith.constant 0 : index
    %c0_25 = arith.constant 0 : index
    %44 = vector.load %arg8[%c0_22, %c0_23, %c0_24, %c0_25] : memref<4x8x8x128xf32, #tpu.memory_space<vmem>>, vector<4x8x8x128xf32>
    tpu.vector_store %arg8[%c0_22, %c0_23, %c0_24, %c0_25], %43 {strides = array<i32>} : memref<4x8x8x128xf32, #tpu.memory_space<vmem>>, vector<4x8x8x128xf32>,
    return
  }
  func.func @transform_0(%arg0: i32) -> (i32, i32, i32, i32) {
    %c0_i32 = arith.constant 0 : i32
    %c0_i32_0 = arith.constant 0 : i32
    %c0_i32_1 = arith.constant 0 : i32
    %c0_i32_2 = arith.constant 0 : i32
    return %arg0, %c0_i32, %c0_i32_0, %c0_i32_1 : i32, i32, i32, i32
  }
  func.func @transform_1(%arg0: i32) -> (i32, i32) {
    %c0_i32 = arith.constant 0 : i32
    %c0_i32_0 = arith.constant 0 : i32
    %c0_i32_1 = arith.constant 0 : i32
    return %c0_i32, %c0_i32_0 : i32, i32
  }
  func.func @transform_2(%arg0: i32) -> (i32, i32) {
    %c0_i32 = arith.constant 0 : i32
    %c0_i32_0 = arith.constant 0 : i32
    %c0_i32_1 = arith.constant 0 : i32
    return %c0_i32, %c0_i32_0 : i32, i32
  }
  func.func @transform_3(%arg0: i32) -> (i32, i32) {
    %c0_i32 = arith.constant 0 : i32
    %c0_i32_0 = arith.constant 0 : i32
    %c0_i32_1 = arith.constant 0 : i32
    return %c0_i32, %c0_i32_0 : i32, i32
  }
  func.func @transform_4(%arg0: i32) -> (i32, i32) {
    %c0_i32 = arith.constant 0 : i32
    %c0_i32_0 = arith.constant 0 : i32
    %c0_i32_1 = arith.constant 0 : i32
    return %c0_i32, %c0_i32_0 : i32, i32
  }
  func.func @transform_5(%arg0: i32) -> (i32, i32) {
    %c0_i32 = arith.constant 0 : i32
    %c0_i32_0 = arith.constant 0 : i32
    %c0_i32_1 = arith.constant 0 : i32
    return %c0_i32, %c0_i32_0 : i32, i32
  }
  func.func @transform_6(%arg0: i32) -> (i32, i32) {
    %c0_i32 = arith.constant 0 : i32
    %c0_i32_0 = arith.constant 0 : i32
    %c0_i32_1 = arith.constant 0 : i32
    return %c0_i32, %c0_i32_0 : i32, i32
  }
  func.func @transform_7(%arg0: i32) -> (i32, i32, i32, i32) {
    %c0_i32 = arith.constant 0 : i32
    %c0_i32_0 = arith.constant 0 : i32
    %c0_i32_1 = arith.constant 0 : i32
    %c0_i32_2 = arith.constant 0 : i32
    return %arg0, %c0_i32, %c0_i32_0, %c0_i32_1 : i32, i32, i32, i32
  }
}

</mosaic_0001>

<bundles_post_ra>
// kernel: tpu_custom_call.1
= control target key start
LH: loop header
LB: loop body
LE: loop exit
PB: predicated region body
PF: predicated region fallthrough
CT: control target
= control target key end

     0   :  { %12 = vsyncpa [#allocation3], 0  ;;  %s4187_s0 = inlined_call_operand.hbm [shape: f32[16,8,8,128], index: 0, kind: input, shape index: {}]   ;;  %s4188_s1 = inlined_call_operand.vmem [shape: bf16[128,32], index: 1, kind: input, shape index: {}]   ;;  %s4189_s2 = inlined_call_operand.vmem [shape: bf16[288,32], index: 2, kind: input, shape index: {}]   ;;  %s4190_s3 = inlined_call_operand.vmem [shape: bf16[32,128], index: 3, kind: input, shape index: {}]   ;;  %s4191_s4 = inlined_call_operand.vmem [shape: f32[1,32], index: 4, kind: input, shape index: {}]   ;;  %s4192_s5 = inlined_call_operand.vmem [shape: f32[1,32], index: 5, kind: input, shape index: {}]   ;;  %s4193_s6 = inlined_call_operand.vmem [shape: f32[1,128], index: 6, kind: input, shape index: {}]   ;;  %s4194_s7 = inlined_call_operand.hbm [shape: f32[16,8,8,128], index: 7, kind: output, shape index: {}]  }
   0x1   :  { %14 = vsyncpa [#allocation3 + $0x1], 0 }
   0x2   :  { %15 = vsyncpa [#allocation4], 0 }
   0x3   :  { %17 = vsyncpa [#allocation4 + $0x1], 0  ;;  %s3002_s24 = smov 0   ;;  %s3004_s25 = smov 0  }
   0x4   :  { %s3006_s26 = smov 0   ;;  %s3008_s27 = smov 0  }
   0x5 LB: > { %s3023_s28 = sadd.s32 4294967295, %s2952_s27   ;;  %s2239_s29 = sadd.s32 4294967294, %s2952_s27   ;;  %s2952_s27 = sphi %s3008_s27, %s4207_s27   ;;  %s2948_s26 = sphi %s3006_s26, %s4206_s26   ;;  %s2944_s25 = sphi %s3004_s25, %s4205_s25   ;;  %s2940_s24 = sphi %s3002_s24, %s4204_s24  }
   0x6   : > { %s3027_s30 = sadd.s32 1, %s2952_s27   ;;  %s30_s8 = sadd.s32 1, %s2948_s26 }
   0x7   : > { %s27_s9 = ssub.s32 %s2952_s27, %s3027_s30  ;;  %p37_p0 = scmp.ne.s32.totalorder %s2948_s26, %s2944_s25 }
   0x8   : > { %p28_p1 = scmp.eq.s32.totalorder %s27_s9, 0  ;;  %p38_p2 = scmp.eq.s32.totalorder %s2952_s27, 0 }
   0x9   : > { %p43_p3 = scmp.ne.s32.totalorder %s2944_s25, %s2940_s24  ;;  %p44_p4 = scmp.eq.s32.totalorder %s3023_s28, 0 }
   0xa   : > { %s3039_s10 = scalar_select %p28_p1, %s2948_s26, %s30_s8  }
   0xb   : > { %p3041_p5 = por %p38_p2, %p37_p0  ;;  %p3045_p6 = por %p44_p4, %p43_p3 }
   0xc   : > { %4195 = sst [smem:[#allocation8_spill]] %s3039_s10  ;;  %p193_p7 = scmp.eq.s32.totalorder %s3023_s28, 3 }
   0xd   : > { %p199_p8 = scmp.eq.s32.totalorder %s2239_s29, 3  ;;  %p2477_p9 = scmp.lt.s32.totalorder %s2952_s27, 4 }
   0xe   : > { %p3051_p10 = por %p193_p7, %p37_p0  ;;  %s237_s15 = sand.u32 1, %s2948_s26  }
   0xf   : > { %p3055_p11 = por %p199_p8, %p43_p3  ;;  %s2416_s16 = sshll.u32 %s2952_s27, 8 }
  0x10   : > { %s2242_s17 = sshll.u32 %s237_s15, 8  ;;  %s247_s20 = scalar_lea.hbm %s4187_s0, %s2416_s16 }
  0x11   : > { %s248_s21 = sshll.u32 %s247_s20, 4  ;;  %s241_s22 = scalar_lea.vmem [#allocation2], %s2242_s17  ;;  %s249_s21 = int_to_ptr.hbm [resolvable:$true] %s248_s21 }
  0x12   : > { %s250_s23 = sshll.u32 %s241_s22, 4  ;;  %p3066_p12 = pnand %p2477_p9, %p3041_p5  ;;  %s251_s23 = int_to_ptr.vmem [resolvable:$true] %s250_s23 }
  0x13   : > { %p2246_p13 = scmp.ge.s32.totalorder %s2952_s27, 1  ;;  %p258_p0 = scmp.lt.s32.totalorder %s2952_s27, 5 }
  0x14   : > { %s238_s8 = scalar_lea.sflag [#allocation3], %s237_s15  ;;  %s2856_s9 = sshra.s32 %s249_s21, 4  ;;  %s2857_s9 = int_to_ptr.hbm [resolvable:$true] %s2856_s9 }
  0x15   : > { %s2858_s10 = scalar_lea.hbm %s2857_s9, 256  ;;  %p2860_p2 = pneg %p3066_p12 }
  0x16   : > { %p2859_p1 = scmp.ne.s32.totalorder %s2857_s9, %s2858_s10  ;;  %s2863_s11 = scalar_lea.hbm %s4187_s0, 1024 }
  0x17   : > { %p2864_p5 = scmp.lt.s32.totalorder %s2857_s9, %s4187_s0  ;;  %p2865_p7 = scmp.lt.s32.totalorder %s2863_s11, %s2858_s10 }
  0x18   : > { %p2861_p3 = pnand %p2860_p2, %p2859_p1 }
  0x19   : > { %p2866_p8 = por %p2865_p7, %p2864_p5 }
  0x1a   : > { %p2862_p4 = pneg %p2861_p3 }
  0x1c   : > { %p2867_p9 = pnand %p2866_p8, %p2862_p4 }
  0x1e   : > { %2870 = shalt.err (!%p2867_p9)
}
  0x1f   : > { %s2954_s15 = smov 128   ;;  %s2955_s20 = smov 8  }
  0x20   : > { %2472 = dma.hbm_to_vmem [thread:$0]  (!%p3066_p12), %s249_s21, 4096, %s251_s23, %s238_s8, %s2954_s15, %s2954_s15, %s2955_s20  }
  0x21   : > { %p259_p1 = pnand %p2246_p13, %p258_p0 }
  0x22   : > { %s3087_s22 = sand.u32 (!%p259_p1), 1, %s2944_s25  }
  0x23   : > { %262 = sbr.rel (%p259_p1) target bundleno = 1322 (0x52a), region = 48  ;;  %s2247_s10 = sshll.u32 (!%p259_p1), %s3087_s22, 8 }
  0x24   : > { %s265_s9 = scalar_lea.sflag (!%p259_p1), [#allocation3], %s3087_s22  ;;  %s3093_s16 = scalar_lea.vmem (!%p259_p1), [#allocation2], %s2247_s10 }
  0x28   : > { %2931 = dma.done.wait (%p3045_p6), %s265_s9, 4096  }
  0x29   : > { %2933 = vsyncadd (%p3045_p6), %s265_s9, 4294963200  ;;  %v2424_v0 = vld [vmem:[%s4188_s1 + $0x38] sm:$0xff]  ;;  %v2423_v1 = vld [vmem:[%s4188_s1 + $0x30] sm:$0xff]  ;;  %vm733_vm0 = vcmask 1046528   ;;  %s2956_s12 = smov 32   ;;  %s2957_s18 = smov 64  }
  0x2a   : > { %419 = vmatpush.bf16.msra.mxu0 %v2424_v0  ;;  %2447 = vmatpush.bf16.msra.mxu1 %v2424_v0  ;;  %v2422_v2 = vld [vmem:[%s4188_s1 + $0x28] sm:$0xff]  ;;  %v2421_v3 = vld [vmem:[%s4188_s1 + $0x20] sm:$0xff]  ;;  %v2420_v4 = vld [vmem:[%s4188_s1 + $0x18] sm:$0xff]  ;;  %vm636_vm1 = vcmask 1040384   ;;  %vm990_vm2 = vcmask 261120   ;;  %vm1023_vm3 = vcmask 523264  }
  0x2b   : > { %2448 = vmatpush.bf16.msra.mxu2 %v2424_v0  ;;  %v2419_v5 = vld [vmem:[%s4188_s1 + $0x10] sm:$0xff]  ;;  %v2418_v6 = vld [vmem:[%s4188_s1 + $0x8] sm:$0xff]  ;;  %v2417_v7 = vld [vmem:[%s4188_s1] sm:$0xff]  ;;  %s2958_s19 = smov 96   ;;  %vm1272_vm4 = vcmask 785408   ;;  %vm2959_vm6 = vmmov 1  }
  0x2c   : > { %v303_v8 = vld [vmem:[%s3093_s16] sm:$0xff]  ;;  %v304_v9 = vld [vmem:[%s3093_s16 + $0x8] sm:$0xff]  ;;  %v305_v11 = vld [vmem:[%s3093_s16 + $0x10] sm:$0xff]  ;;  %s3998_s17 = scalar_lea.vmem [#allocation5], %s2247_s10  ;;  %s2446_s10 = sshll.u32 %s3023_s28, 8 }
  0x2d   : > { %v335_v10 = vpack.c.bf16 %v304_v9, %v303_v8  ;;  %v306_v12 = vld [vmem:[%s3093_s16 + $0x18] sm:$0xff]  ;;  %v323_v14 = vld [vmem:[%s3093_s16 + $0xa0] sm:$0xff]  ;;  %v324_v15 = vld [vmem:[%s3093_s16 + $0xa8] sm:$0xff]  ;;  %s2162_s20 = scalar_lea.hbm %s4194_s7, %s2446_s10  ;;  %s2150_s9 = scalar_lea.sflag [#allocation4], %s3087_s22 }
  0x2e   : > { %420 = vmatpush.bf16.msra.mxu0 %v2423_v1  ;;  %2449 = vmatpush.bf16.msra.mxu1 %v2423_v1  ;;  %v336_v13 = vpack.c.bf16 %v306_v12, %v305_v11  ;;  %v345_v16 = vpack.c.bf16 %v324_v15, %v323_v14  ;;  %v307_v17 = vld [vmem:[%s3093_s16 + $0x20] sm:$0xff]  ;;  %v308_v18 = vld [vmem:[%s3093_s16 + $0x28] sm:$0xff]  ;;  %v309_v20 = vld [vmem:[%s3093_s16 + $0x30] sm:$0xff] }
  0x2f   : > { %2450 = vmatpush.bf16.msra.mxu2 %v2423_v1  ;;  %v337_v19 = vpack.c.bf16 %v308_v18, %v307_v17  ;;  %v310_v21 = vld [vmem:[%s3093_s16 + $0x38] sm:$0xff]  ;;  %v311_v23 = vld [vmem:[%s3093_s16 + $0x40] sm:$0xff]  ;;  %v312_v24 = vld [vmem:[%s3093_s16 + $0x48] sm:$0xff] }
  0x30   : > { %v338_v22 = vpack.c.bf16 %v310_v21, %v309_v20  ;;  %v339_v25 = vpack.c.bf16 %v312_v24, %v311_v23  ;;  %v325_v26 = vld [vmem:[%s3093_s16 + $0xb0] sm:$0xff]  ;;  %v326_v27 = vld [vmem:[%s3093_s16 + $0xb8] sm:$0xff]  ;;  %v315_v32 = vld [vmem:[%s3093_s16 + $0x60] sm:$0xff] }
  0x31   : > { %v346_v28 = vpack.c.bf16 %v326_v27, %v325_v26  ;;  %v313_v29 = vld [vmem:[%s3093_s16 + $0x50] sm:$0xff]  ;;  %v314_v30 = vld [vmem:[%s3093_s16 + $0x58] sm:$0xff]  ;;  %v316_v33 = vld [vmem:[%s3093_s16 + $0x68] sm:$0xff] }
  0x32   : > { %421 = vmatpush.bf16.msra.mxu0 %v2422_v2  ;;  %2451 = vmatpush.bf16.msra.mxu1 %v2422_v2  ;;  %v340_v31 = vpack.c.bf16 %v314_v30, %v313_v29  ;;  %v341_v34 = vpack.c.bf16 %v316_v33, %v315_v32  ;;  %v3144_v35 = vld [vmem:[%s4191_s4] ss:$0 sm:$0xff]  ;;  %v317_v43 = vld [vmem:[%s3093_s16 + $0x70] sm:$0xff]  ;;  %v318_v44 = vld [vmem:[%s3093_s16 + $0x78] sm:$0xff] }
  0x33   : > { %2452 = vmatpush.bf16.msra.mxu2 %v2422_v2  ;;  %v342_v45 = vpack.c.bf16 %v318_v44, %v317_v43  ;;  %v319_v58 = vld [vmem:[%s3093_s16 + $0x80] sm:$0xff]  ;;  %v320_v59 = vld [vmem:[%s3093_s16 + $0x88] sm:$0xff]  ;;  %v322_v8 = vld [vmem:[%s3093_s16 + $0x98] sm:$0xff] }
  0x34   : > { %v343_v60 = vpack.c.bf16 %v320_v59, %v319_v58  ;;  %v327_v1 = vld [vmem:[%s3093_s16 + $0xc0] sm:$0xff]  ;;  %v329_v15 = vld [vmem:[%s3093_s16 + $0xd0] sm:$0xff]  ;;  %v332_v30 = vld [vmem:[%s3093_s16 + $0xe8] sm:$0xff] }
  0x35   : > { %v331_v29 = vld [vmem:[%s3093_s16 + $0xe0] sm:$0xff]  ;;  %vm2353_vm5 = vmneg %vm1272_vm4 }
  0x36   : > { %422 = vmatpush.bf16.msra.mxu0 %v2421_v3  ;;  %2453 = vmatpush.bf16.msra.mxu1 %v2421_v3  ;;  %v349_v32 = vpack.c.bf16 %v332_v30, %v331_v29  ;;  %vm3408_vm7 = vmpackc.low %vm2959_vm6, %vm2353_vm5 }
  0x37   : > { %2454 = vmatpush.bf16.msra.mxu2 %v2421_v3 }
  0x3a   : > { %423 = vmatpush.bf16.msra.mxu0 %v2420_v4  ;;  %2455 = vmatpush.bf16.msra.mxu1 %v2420_v4 }
  0x3b   : > { %2456 = vmatpush.bf16.msra.mxu2 %v2420_v4  ;;  %v328_v4 = vld [vmem:[%s3093_s16 + $0xc8] sm:$0xff] }
  0x3e   : > { %424 = vmatpush.bf16.msra.mxu0 %v2419_v5  ;;  %2457 = vmatpush.bf16.msra.mxu1 %v2419_v5 }
  0x3f   : > { %2458 = vmatpush.bf16.msra.mxu2 %v2419_v5  ;;  %v347_v5 = vpack.c.bf16 %v328_v4, %v327_v1 }
  0x42   : > { %425 = vmatpush.bf16.msra.mxu0 %v2418_v6  ;;  %2459 = vmatpush.bf16.msra.mxu1 %v2418_v6 }
  0x43   : > { %2460 = vmatpush.bf16.msra.mxu2 %v2418_v6 }
  0x46   : > { %426 = vmatpush.bf16.msra.mxu0 %v2417_v7  ;;  %2461 = vmatpush.bf16.msra.mxu1 %v2417_v7 }
  0x47   : > { %2462 = vmatpush.bf16.msra.mxu2 %v2417_v7  ;;  %v321_v7 = vld [vmem:[%s3093_s16 + $0x90] sm:$0xff] }
  0x48   : > { %v344_v12 = vpack.c.bf16 %v322_v8, %v321_v7 }
  0x49   : > { %427 = vmatmul.bf16.vlgmr.msra.gmra.mxu0 %v335_v10  ;;  %477 = vmatmul.bf16.vlgmr.msra.gmra.mxu1 %v345_v16  ;;  %v330_v16 = vld [vmem:[%s3093_s16 + $0xd8] sm:$0xff] }
  0x4a   : > { %487 = vmatmul.bf16.vlgmr.msra.gmra.mxu2 %v347_v5 }
  0x59   : > { %432 = vmatmul.bf16.gmra.mxu0 %v336_v13  ;;  %482 = vmatmul.bf16.gmra.mxu1 %v346_v28 }
  0x69   : > { %437 = vmatmul.bf16.gmra.mxu0 %v337_v19  ;;  %v348_v19 = vpack.c.bf16 %v330_v16, %v329_v15 }
  0x6b   : > { %492 = vmatmul.bf16.gmra.mxu2 %v348_v19 }
  0x79   : > { %442 = vmatmul.bf16.gmra.mxu0 %v338_v22 }
  0x7b   : > { %497 = vmatmul.bf16.gmra.mxu2 %v349_v32 }
  0x89   : > { %447 = vmatmul.bf16.gmra.mxu0 %v339_v25 }
  0x99   : > { %452 = vmatmul.bf16.gmra.mxu0 %v340_v31 }
  0xa9   : > { %457 = vmatmul.bf16.gmra.mxu0 %v341_v34 }
  0xb9   : > { %462 = vmatmul.bf16.gmra.mxu0 %v342_v45 }
  0xc6   : > { %v428_v36 = vpop.f32.mrf.mxu0  ;;  %v3209_v33 = vpop.f32.mrf.mxu1 }
  0xc7   : > { %v429_v37 = vadd.f32 %v3144_v35, %v428_v36  ;;  %v333_v36 = vld [vmem:[%s3093_s16 + $0xf0] sm:$0xff] }
  0xc9   : > { %v3147_v38 = vmax.f32 %v429_v37, 0.0  ;;  %467 = vmatmul.bf16.gmra.mxu0 %v343_v60  ;;  %v334_v37 = vld [vmem:[%s3093_s16 + $0xf8] sm:$0xff] }
  0xcb   : > { %v669_v42 = vrot.slane %v3147_v38, 1 }
  0xcd   : > { %v734_v48 = vsel %vm733_vm0, %v669_v42, 0.0 }
  0xce   : > { %v430_v39 = vpop.f32.mrf.mxu0  ;;  %v480_v34 = vpop.f32.mrf.mxu1 }
  0xcf   : > { %v431_v40 = vadd.f32 %v3144_v35, %v430_v39  ;;  %v481_v43 = vadd.f32 %v3144_v35, %v480_v34 }
  0xd1   : > { %v3150_v41 = vmax.f32 %v431_v40, 0.0  ;;  %v350_v40 = vpack.c.bf16 %v334_v37, %v333_v36 }
  0xd3   : > { %v2520_v46 = vpack.i.bf16 %v3150_v41, %v3147_v38  ;;  %v670_v47 = vrot.slane %v3150_v41, 1  ;;  %502 = vmatmul.bf16.gmra.mxu2 %v350_v40 }
  0xd5   : > { %2521 = vrot.lane.b32.xlu0 %v2520_v46, %s2956_s12  ;;  %v735_v49 = vsel %vm733_vm0, %v670_v47, 0.0  ;;  %v572_v46 = vrot.slane %v3147_v38, 7  ;;  %v573_v47 = vrot.slane %v3150_v41, 7 }
  0xd6   : > { %v433_v50 = vpop.f32.mrf.mxu0  ;;  %v2530_v51 = vpack.i.bf16 %v735_v49, %v734_v48  ;;  %v483_v42 = vpop.f32.mrf.mxu1  ;;  %v3217_v49 = vmax.f32 %v481_v43, 0.0 }
  0xd7   : > { %v434_v52 = vadd.f32 %v3144_v35, %v433_v50  ;;  %v484_v44 = vadd.f32 %v3144_v35, %v483_v42  ;;  %v638_v58 = vsel %vm636_vm1, 0.0, %v573_v47 }
  0xd8   : > { %2531 = vrot.lane.b32.xlu1 %v2530_v51, %s2957_s18  ;;  %v690_v41 = vrot.slane %v3217_v49, 1 }
  0xd9   : > { %v3163_v53 = vmax.f32 %v434_v52, 0.0  ;;  %472 = vmatmul.bf16.gmra.mxu0 %v344_v12 }
  0xdb   : > { %v671_v56 = vrot.slane %v3163_v53, 1  ;;  %v574_v12 = vrot.slane %v3163_v53, 7 }
  0xdd   : > { %v736_v63 = vsel %vm733_vm0, %v671_v56, 0.0  ;;  %v637_v56 = vsel %vm636_vm1, 0.0, %v572_v46 }
  0xde   : > { %v435_v54 = vpop.f32.mrf.mxu0  ;;  %v485_v8 = vpop.f32.mrf.mxu1 }
  0xdf   : > { %v436_v55 = vadd.f32 %v3144_v35, %v435_v54  ;;  %v3220_v54 = vmax.f32 %v484_v44, 0.0  ;;  %v486_v19 = vadd.f32 %v3144_v35, %v485_v8 }
  0xe1   : > { %v3167_v57 = vmax.f32 %v436_v55, 0.0  ;;  %v3269_v36 = vmax.f32 %v486_v19, 0.0 }
  0xe3   : > { %v672_v61 = vrot.slane %v3167_v57, 1  ;;  %v2525_v62 = vpack.i.bf16 %v3167_v57, %v3163_v53  ;;  %v575_v16 = vrot.slane %v3167_v57, 7  ;;  %v639_v57 = vsel %vm636_vm1, 0.0, %v574_v12 }
  0xe5   : > { %2526 = vrot.lane.b32.xlu0 %v2525_v62, %s2956_s12  ;;  %v737_v0 = vsel %vm733_vm0, %v672_v61, 0.0  ;;  %v691_v62 = vrot.slane %v3220_v54, 1 }
  0xe6   : > { %v438_v2 = vpop.f32.mrf.mxu0  ;;  %v2535_v3 = vpack.i.bf16 %v737_v0, %v736_v63 }
  0xe7   : > { %v439_v6 = vadd.f32 %v3144_v35, %v438_v2  ;;  %v756_v7 = vsel %vm733_vm0, %v691_v62, 0.0 }
  0xe8   : > { %2536 = vrot.lane.b32.xlu1 %v2535_v3, %s2957_s18 }
  0xe9   : > { %v3183_v10 = vmax.f32 %v439_v6, 0.0  ;;  %v755_v6 = vsel %vm733_vm0, %v690_v41, 0.0 }
  0xeb   : > { %v673_v14 = vrot.slane %v3183_v10, 1 }
  0xed   : > { %v738_v21 = vsel %vm733_vm0, %v673_v14, 0.0 }
  0xee   : > { %v440_v9 = vpop.f32.mrf.mxu0 }
  0xef   : > { %v441_v11 = vadd.f32 %v3144_v35, %v440_v9  ;;  %v2560_v9 = vpack.i.bf16 %v3220_v54, %v3217_v49 }
  0xf1   : > { %v3186_v13 = vmax.f32 %v441_v11, 0.0  ;;  %v2570_v11 = vpack.i.bf16 %v756_v7, %v755_v6  ;;  %v2432_v6 = vld [vmem:[%s4189_s2 + $0x38] sm:$0xff] }
  0xf2   : > { %1581 = vmatpush.bf16.msrb.mxu1 %v2432_v6 }
  0xf3   : > { %v674_v17 = vrot.slane %v3186_v13, 1  ;;  %v2540_v18 = vpack.i.bf16 %v3186_v13, %v3183_v10 }
  0xf5   : > { %2541 = vrot.lane.b32.xlu2 %v2540_v18, %s2956_s12  ;;  %v739_v22 = vsel %vm733_vm0, %v674_v17, 0.0  ;;  %v576_v17 = vrot.slane %v3183_v10, 7 }
  0xf6   : > { %v443_v20 = vpop.f32.mrf.mxu0  ;;  %v2545_v23 = vpack.i.bf16 %v739_v22, %v738_v21 }
  0xf7   : > { %v444_v24 = vadd.f32 %v3144_v35, %v443_v20  ;;  %v641_v29 = vsel %vm636_vm1, 0.0, %v576_v17 }
  0xf9   : > { %v3199_v26 = vmax.f32 %v444_v24, 0.0 }
  0xfb   : > { %v675_v52 = vrot.slane %v3199_v26, 1 }
  0xfd   : > { %2546 = vrot.lane.b32.xlu2 %v2545_v23, %s2957_s18  ;;  %v740_v63 = vsel %vm733_vm0, %v675_v52, 0.0 }
  0xfe   : > { %v445_v25 = vpop.f32.mrf.mxu0 }
  0xff   : > { %v446_v27 = vadd.f32 %v3144_v35, %v445_v25 }
 0x101   : > { %v3202_v28 = vmax.f32 %v446_v27, 0.0 }
 0x103   : > { %v2550_v31 = vpack.i.bf16 %v3202_v28, %v3199_v26  ;;  %v676_v20 = vrot.slane %v3202_v28, 1 }
 0x105   : > { %2551 = vrot.lane.b32.xlu0 %v2550_v31, %s2956_s12  ;;  %v640_v31 = vsel %vm636_vm1, 0.0, %v575_v16  ;;  %v741_v42 = vsel %vm733_vm0, %v676_v20, 0.0  ;;  %v2430_v16 = vld [vmem:[%s4189_s2 + $0x28] sm:$0xff]  ;;  %v2429_v20 = vld [vmem:[%s4189_s2 + $0x20] sm:$0xff] }
 0x106   : > { %v448_v39 = vpop.f32.mrf.mxu0 }
 0x107   : > { %v449_v14 = vadd.f32 %v3144_v35, %v448_v39 }
 0x109   : > { %v3260_v10 = vmax.f32 %v449_v14, 0.0 }
 0x10b   : > { %v677_v37 = vrot.slane %v3260_v10, 1 }
 0x10e   : > { %v450_v45 = vpop.f32.mrf.mxu0 }
 0x10f   : > { %v451_v15 = vadd.f32 %v3144_v35, %v450_v45 }
 0x111   : > { %v3262_v25 = vmax.f32 %v451_v15, 0.0 }
 0x113   : > { %v678_v43 = vrot.slane %v3262_v25, 1 }
 0x116   : > { %v453_v5 = vpop.f32.mrf.mxu0 }
 0x117   : > { %v454_v18 = vadd.f32 %v3144_v35, %v453_v5 }
 0x119   : > { %v3266_v30 = vmax.f32 %v454_v18, 0.0 }
 0x11b   : > { %v679_v52 = vrot.slane %v3266_v30, 1  ;;  %v2585_v62 = vpack.i.bf16 %v3269_v36, %v3266_v30 }
 0x11d   : > { %v744_v41 = vsel %vm733_vm0, %v679_v52, 0.0 }
 0x11e   : > { %v455_v32 = vpop.f32.mrf.mxu0 }
 0x147   : > { %v2522_v48 = vpop.permute.xlu0 %2521 }
 0x148   : > { %v2524_v50 = vunpack.i.h.bf16 %v2522_v48  ;;  %v2523_v51 = vunpack.i.l.bf16 %v2522_v48 }
 0x14a   : > { %v2532_v55 = vpop.permute.xlu1 %2531  ;;  %v992_v60 = vsel %vm990_vm2, %v638_v58, %v2524_v50  ;;  %v991_v61 = vsel %vm990_vm2, %v637_v56, %v2523_v51  ;;  %v2575_v51 = vpack.i.bf16 %v3262_v25, %v3260_v10 }
 0x14b   : > { %v2534_v38 = vunpack.i.h.bf16 %v2532_v55  ;;  %v2533_v59 = vunpack.i.l.bf16 %v2532_v55  ;;  %v692_v55 = vrot.slane %v3269_v36, 1 }
 0x14d   : > { %v3230_v0 = vsel %vm1023_vm3, %v992_v60, %v2534_v38  ;;  %v3233_v1 = vsel %vm1023_vm3, %v991_v61, %v2533_v59  ;;  %v742_v38 = vsel %vm733_vm0, %v677_v37, 0.0  ;;  %v743_v59 = vsel %vm733_vm0, %v678_v43, 0.0  ;;  %v458_v61 = vpop.f32.mrf.mxu0  ;;  %v2426_v37 = vld [vmem:[%s4189_s2 + $0x8] sm:$0xff]  ;;  %v3362_v43 = vpop.f32.mrf.mxu2 }
 0x14e   : > { %v2555_v2 = vpack.i.bf16 %v3230_v0, %v740_v63  ;;  %v2565_v3 = vpack.i.bf16 %v3230_v0, %v3233_v1  ;;  %v757_v60 = vsel %vm733_vm0, %v692_v55, 0.0  ;;  %v2600_v63 = vpack.i.bf16 %v743_v59, %v742_v38  ;;  %v2439_v38 = vld [vmem:[%s4189_s2 + $0x70] sm:$0xff] }
 0x14f   : > { %v3238_v4 = vpop.permute.xlu2 %2541  ;;  %v2605_v5 = vpack.i.bf16 %v757_v60, %v744_v41  ;;  %v2438_v60 = vld [vmem:[%s4189_s2 + $0x68] sm:$0xff] }
 0x150   : > { %2556 = vrot.lane.b32.xlu1 %v2555_v2, %s2957_s18  ;;  %2566 = vrot.lane.b32.xlu2 %v2565_v3, %s2958_s19  ;;  %v2543_v23 = vunpack.i.l.bf16 %v3238_v4  ;;  %v456_v2 = vadd.f32 %v3144_v35, %v455_v32  ;;  %v459_v3 = vadd.f32 %v3144_v35, %v458_v61 }
 0x152   : > { %v995_v44 = vsel %vm990_vm2, %v641_v29, %v2543_v23  ;;  %v3309_v7 = vmax.f32 %v456_v2, 0.0  ;;  %v3311_v8 = vmax.f32 %v459_v3, 0.0  ;;  %v577_v23 = vrot.slane %v3186_v13, 7  ;;  %v2427_v13 = vld [vmem:[%s4189_s2 + $0x10] sm:$0xff]  ;;  %v2437_v2 = vld [vmem:[%s4189_s2 + $0x60] sm:$0xff]  ;;  %v2436_v3 = vld [vmem:[%s4189_s2 + $0x58] sm:$0xff] }
 0x154   : > { %v681_v12 = vrot.slane %v3311_v8, 1  ;;  %v2610_v14 = vpack.i.bf16 %v3311_v8, %v3309_v7 }
 0x155   : > { %v460_v17 = vpop.f32.mrf.mxu0 }
 0x156   : > { %v746_v19 = vsel %vm733_vm0, %v681_v12, 0.0  ;;  %v461_v32 = vadd.f32 %v3144_v35, %v460_v17 }
 0x157   : > { %v3254_v21 = vpop.permute.xlu2 %2546  ;;  %v2527_v22 = vpop.permute.xlu0 %2526 }
 0x158   : > { %v2529_v53 = vunpack.i.h.bf16 %v2527_v22  ;;  %v2528_v24 = vunpack.i.l.bf16 %v2527_v22  ;;  %2561 = vrot.lane.b32.xlu1 %v2560_v9, %s2956_s12  ;;  %2571 = vrot.lane.b32.xlu2 %v2570_v11, %s2957_s18  ;;  %v2548_v27 = vunpack.i.l.bf16 %v3254_v21  ;;  %v2431_v9 = vld [vmem:[%s4189_s2 + $0x30] sm:$0xff]  ;;  %v680_v11 = vrot.slane %v3309_v7, 1 }
 0x159   : > { %1582 = vmatpush.bf16.msrb.mxu1 %v2431_v9 }
 0x15a   : > { %v2537_v34 = vpop.permute.xlu1 %2536  ;;  %v994_v45 = vsel %vm990_vm2, %v640_v31, %v2529_v53  ;;  %v993_v46 = vsel %vm990_vm2, %v639_v57, %v2528_v24  ;;  %v3284_v50 = vsel %vm1023_vm3, %v995_v44, %v2548_v27  ;;  %v745_v18 = vsel %vm733_vm0, %v680_v11, 0.0  ;;  %v2428_v24 = vld [vmem:[%s4189_s2 + $0x18] sm:$0xff]  ;;  %v2425_v44 = vld [vmem:[%s4189_s2] sm:$0xff] }
 0x15b   : > { %v2539_v39 = vunpack.i.h.bf16 %v2537_v34  ;;  %v2538_v40 = vunpack.i.l.bf16 %v2537_v34  ;;  %v2615_v22 = vpack.i.bf16 %v746_v19, %v745_v18  ;;  %v2544_v53 = vunpack.i.h.bf16 %v3238_v4  ;;  %v2442_v18 = vld [vmem:[%s4189_s2 + $0x88] sm:$0xff] }
 0x15c   : > { %v2549_v57 = vunpack.i.h.bf16 %v3254_v21  ;;  %v642_v27 = vsel %vm636_vm1, 0.0, %v577_v23  ;;  %1765 = vmatpush.bf16.msrb.mxu0 %v2442_v18  ;;  %2463 = vmatpush.bf16.msra.mxu3 %v2442_v18  ;;  %v2441_v23 = vld [vmem:[%s4189_s2 + $0x80] sm:$0xff] }
 0x15d   : > { %v3278_v47 = vsel %vm1023_vm3, %v993_v46, %v2538_v40  ;;  %v3281_v48 = vsel %vm1023_vm3, %v994_v45, %v2539_v39  ;;  %1583 = vmatpush.bf16.msrb.mxu1 %v2430_v16  ;;  %v996_v29 = vsel %vm990_vm2, %v642_v27, %v2544_v53  ;;  %v463_v31 = vpop.f32.mrf.mxu0  ;;  %v3355_v39 = vmax.f32 %v461_v32, 0.0  ;;  %v490_v45 = vpop.f32.mrf.mxu2  ;;  %v2440_v46 = vld [vmem:[%s4189_s2 + $0x78] sm:$0xff]  ;;  %v2433_v53 = vld [vmem:[%s4189_s2 + $0x40] sm:$0xff] }
 0x15e   : > { %v2580_v56 = vpack.i.bf16 %v741_v42, %v3278_v47  ;;  %v2595_v58 = vpack.i.bf16 %v3284_v50, %v3281_v48  ;;  %v2590_v15 = vpack.i.bf16 %v3281_v48, %v3278_v47  ;;  %v3346_v4 = vsel %vm1023_vm3, %v996_v29, %v2549_v57  ;;  %1670 = vmatpush.bf16.msrb.mxu2 %v2440_v46 }
 0x15f   : > { %v464_v34 = vadd.f32 %v3144_v35, %v463_v31  ;;  %v2620_v21 = vpack.i.bf16 %v3346_v4, %v3284_v50  ;;  %v578_v57 = vrot.slane %v3199_v26, 7 }
 0x160   : > { %2581 = vrot.lane.b32.xlu0 %v2580_v56, %s2957_s18  ;;  %2596 = vrot.lane.b32.xlu1 %v2595_v58, %s2957_s18 }
 0x161   : > { %2576 = vrot.lane.b32.xlu2 %v2575_v51, %s2956_s12  ;;  %1584 = vmatpush.bf16.msrb.mxu1 %v2429_v20  ;;  %v3357_v40 = vmax.f32 %v464_v34, 0.0  ;;  %v491_v51 = vadd.f32 %v3144_v35, %v490_v45  ;;  %v643_v31 = vsel %vm636_vm1, 0.0, %v578_v57  ;;  %v594_v45 = vrot.slane %v3220_v54, 7 }
 0x162   : > { %1671 = vmatpush.bf16.msrb.mxu2 %v2439_v38  ;;  %1766 = vmatpush.bf16.msrb.mxu0 %v2441_v23 }
 0x163   : > { %v2645_v42 = vpack.i.bf16 %v3357_v40, %v3355_v39  ;;  %v3372_v55 = vmax.f32 %v491_v51, 0.0  ;;  %v683_v6 = vrot.slane %v3357_v40, 1  ;;  %2464 = vmatpush.bf16.msra.mxu3 %v2441_v23 }
 0x165   : > { %1585 = vmatpush.bf16.msrb.mxu1 %v2428_v24  ;;  %v493_v52 = vpop.f32.mrf.mxu2  ;;  %v694_v59 = vrot.slane %v3372_v55, 1  ;;  %v3421_v20 = vsel %vm733_vm0, %v683_v6, 0.0 }
 0x166   : > { %v494_v56 = vadd.f32 %v3144_v35, %v493_v52  ;;  %1672 = vmatpush.bf16.msrb.mxu2 %v2438_v60  ;;  %v579_v60 = vrot.slane %v3202_v28, 7 }
 0x167   : > { %v759_v61 = vsel %vm733_vm0, %v694_v59, 0.0  ;;  %v659_v59 = vsel %vm636_vm1, 0.0, %v594_v45 }
 0x168   : > { %2586 = vrot.lane.b32.xlu0 %v2585_v62, %s2956_s12  ;;  %2601 = vrot.lane.b32.xlu1 %v2600_v63, %s2957_s18  ;;  %v3375_v58 = vmax.f32 %v494_v56, 0.0  ;;  %v644_v18 = vsel %vm636_vm1, 0.0, %v579_v60 }
 0x169   : > { %2606 = vrot.lane.b32.xlu2 %v2605_v5, %s2957_s18  ;;  %1586 = vmatpush.bf16.msrb.mxu1 %v2427_v13  ;;  %v682_v5 = vrot.slane %v3355_v39, 1 }
 0x16a   : > { %v695_v41 = vrot.slane %v3375_v58, 1  ;;  %1673 = vmatpush.bf16.msrb.mxu2 %v2437_v2 }
 0x16b   : > { %v3418_v19 = vsel %vm733_vm0, %v682_v5, 0.0 }
 0x16c   : > { %v760_v62 = vsel %vm733_vm0, %v695_v41, 0.0 }
 0x16d   : > { %1587 = vmatpush.bf16.msrb.mxu1 %v2426_v37  ;;  %v2635_v63 = vpack.i.bf16 %v760_v62, %v759_v61  ;;  %v495_v27 = vpop.f32.mrf.mxu2  ;;  %v465_v62 = vpop.f32.mrf.mxu0 }
 0x16e   : > { %1674 = vmatpush.bf16.msrb.mxu2 %v2436_v3  ;;  %v496_v54 = vadd.f32 %v3144_v35, %v495_v27 }
 0x170   : > { %2591 = vrot.lane.b32.xlu0 %v2590_v15, %s2958_s19 }
 0x171   : > { %2611 = vrot.lane.b32.xlu2 %v2610_v14, %s2956_s12  ;;  %1588 = vmatpush.bf16.msrb.mxu1 %v2425_v44  ;;  %v2435_v14 = vld [vmem:[%s4189_s2 + $0x50] sm:$0xff]  ;;  %v593_v44 = vrot.slane %v3217_v49, 7 }
 0x172   : > { %1675 = vmatpush.bf16.msrb.mxu2 %v2435_v14 }
 0x173   : > { %v658_v41 = vsel %vm636_vm1, 0.0, %v593_v44 }
 0x175   : > { %v498_v26 = vpop.f32.mrf.mxu2 }
 0x176   : > { %v499_v28 = vadd.f32 %v3144_v35, %v498_v26 }
 0x177   : > { %v2552_v24 = vpop.permute.xlu0 %2551 }
 0x178   : > { %2616 = vrot.lane.b32.xlu0 %v2615_v22, %s2957_s18  ;;  %v2434_v22 = vld [vmem:[%s4189_s2 + $0x48] sm:$0xff]  ;;  %v2553_v29 = vunpack.i.l.bf16 %v2552_v24  ;;  %v2554_v14 = vunpack.i.h.bf16 %v2552_v24  ;;  %v3473_v57 = vmax.f32 %v499_v28, 0.0  ;;  %v466_v24 = vadd.f32 %v3144_v35, %v465_v62 }
 0x179   : > { %2636 = vrot.lane.b32.xlu2 %v2635_v63, %s2957_s18  ;;  %1676 = vmatpush.bf16.msrb.mxu2 %v2434_v22  ;;  %v2630_v63 = vpack.i.bf16 %v3375_v58, %v3372_v55  ;;  %v3469_v22 = vmax.f32 %v496_v54, 0.0 }
 0x17a   : > { %v997_v34 = vsel %vm990_vm2, %v643_v31, %v2553_v29  ;;  %v998_v31 = vsel %vm990_vm2, %v644_v18, %v2554_v14 }
 0x17d   : > { %1677 = vmatpush.bf16.msrb.mxu2 %v2433_v53 }
 0x180   : > { %2621 = vrot.lane.b32.xlu0 %v2620_v21, %s2958_s19 }
 0x188   : > { %2646 = vrot.lane.b32.xlu0 %v2645_v42, %s2956_s12 }
 0x1aa   : > { %v3396_v9 = vpop.permute.xlu2 %2566 }
 0x1ab   : > { %v2569_v11 = vunpack.i.h.bf16 %v3396_v9  ;;  %v2568_v12 = vunpack.i.l.bf16 %v3396_v9  ;;  %v468_v9 = vpop.f32.mrf.mxu0 }
 0x1ad   : > { %v1274_v15 = vsel %vm1272_vm4, %v3233_v1, %v2569_v11  ;;  %v2660_v1 = vpack.i.bf16 %v3421_v20, %v3418_v19 }
 0x1ae   : > { %v2355_v17 = vpack.c.bf16 %v1274_v15, %v2568_v12 }
 0x1b0   : > { %2356 = vmatmul.msk.bf16.vlgmr.msrb.gmra.mxu1 %vm3408_vm7, %v2355_v17  ;;  %v500_v17 = vpop.f32.mrf.mxu2 }
 0x1b2   : > { %v2572_v21 = vpop.permute.xlu2 %2571 }
 0x1b3   : > { %v2574_v46 = vunpack.i.h.bf16 %v2572_v21  ;;  %v2573_v51 = vunpack.i.l.bf16 %v2572_v21 }
 0x1bb   : > { %v3461_v5 = vpop.permute.xlu2 %2576 }
 0x1c2   : > { %v2557_v13 = vpop.permute.xlu1 %2556 }
 0x1c3   : > { %v2558_v32 = vunpack.i.l.bf16 %v2557_v13  ;;  %v2559_v15 = vunpack.i.h.bf16 %v2557_v13 }
 0x1c5   : > { %v3440_v37 = vsel %vm1023_vm3, %v997_v34, %v2558_v32  ;;  %v1305_v34 = vsel %vm1023_vm3, %v2568_v12, %v2559_v15  ;;  %v582_v12 = vrot.slane %v3266_v30, 7  ;;  %v595_v30 = vrot.slane %v3269_v36, 7 }
 0x1c6   : > { %v2625_v42 = vpack.i.bf16 %v3440_v37, %v3346_v4 }
 0x1c7   : > { %v647_v14 = vsel %vm636_vm1, 0.0, %v582_v12 }
 0x1c8   : > { %2626 = vrot.lane.b32.xlu1 %v2625_v42, %s2957_s18  ;;  %v581_v42 = vrot.slane %v3262_v25, 7  ;;  %v3495_v25 = vmax.f32 %v466_v24, 0.0  ;;  %v501_v24 = vadd.f32 %v3144_v35, %v500_v17 }
 0x1ca   : > { %v2562_v52 = vpop.permute.xlu1 %2561  ;;  %v646_v60 = vsel %vm636_vm1, 0.0, %v581_v42  ;;  %v684_v36 = vrot.slane %v3495_v25, 1 }
 0x1cb   : > { %v2564_v56 = vunpack.i.h.bf16 %v2562_v52  ;;  %v2563_v38 = vunpack.i.l.bf16 %v2562_v52  ;;  %v2665_v52 = vpack.i.bf16 %v3473_v57, %v3469_v22 }
 0x1cd   : > { %v1013_v61 = vsel %vm990_vm2, %v659_v59, %v2564_v56  ;;  %v1012_v49 = vsel %vm990_vm2, %v658_v41, %v2563_v38  ;;  %v469_v56 = vadd.f32 %v3144_v35, %v468_v9  ;;  %v2607_v38 = vpop.permute.xlu2 %2606  ;;  %v503_v59 = vpop.f32.mrf.mxu2  ;;  %v580_v41 = vrot.slane %v3260_v10, 7 }
 0x1ce   : > { %v3456_v2 = vsel %vm1023_vm3, %v1012_v49, %v2573_v51  ;;  %v3459_v3 = vsel %vm1023_vm3, %v1013_v61, %v2574_v46  ;;  %v696_v46 = vrot.slane %v3469_v22, 1  ;;  %v697_v51 = vrot.slane %v3473_v57, 1 }
 0x1cf   : > { %v2640_v6 = vpack.i.bf16 %v3459_v3, %v3456_v2  ;;  %v2608_v61 = vunpack.i.l.bf16 %v2607_v38  ;;  %v504_v10 = vadd.f32 %v3144_v35, %v503_v59  ;;  %v645_v17 = vsel %vm636_vm1, 0.0, %v580_v41 }
 0x1d0   : > { %2631 = vrot.lane.b32.xlu1 %v2630_v63, %s2956_s12  ;;  %v761_v28 = vsel %vm733_vm0, %v696_v46, 0.0  ;;  %v749_v9 = vsel %vm733_vm0, %v684_v36, 0.0 }
 0x1d1   : > { %2641 = vrot.lane.b32.xlu2 %v2640_v6, %s2957_s18  ;;  %v762_v6 = vsel %vm733_vm0, %v697_v51, 0.0  ;;  %v584_v51 = vrot.slane %v3311_v8, 7 }
 0x1d2   : > { %v2582_v23 = vpop.permute.xlu0 %2581  ;;  %v3471_v53 = vpop.permute.xlu1 %2596 }
 0x1d3   : > { %v2584_v27 = vunpack.i.h.bf16 %v2582_v23  ;;  %v2583_v29 = vunpack.i.l.bf16 %v2582_v23  ;;  %v3508_v23 = vmax.f32 %v469_v56, 0.0 }
 0x1d5   : > { %v1339_v32 = vpack.c.bf16 %v2583_v29, %v2559_v15  ;;  %v1031_v13 = vsel %vm1023_vm3, %v998_v31, %v2584_v27  ;;  %v1306_v21 = vsel %vm1023_vm3, %v2569_v11, %v2583_v29  ;;  %v2579_v11 = vunpack.i.h.bf16 %v3461_v5  ;;  %v2612_v41 = vpop.permute.xlu2 %2611 }
 0x1d6   : > { %v2650_v44 = vpack.i.bf16 %v1031_v13, %v3440_v37  ;;  %v2655_v45 = vpack.i.bf16 0.0, %v1031_v13  ;;  %v1338_v26 = vpack.c.bf16 %v1306_v21, %v1305_v34  ;;  %v2578_v31 = vunpack.i.l.bf16 %v3461_v5 }
 0x1d7   : > { %2369 = vmatmul.msk.bf16.vlgmr.msrb.gmra.mxu0 %vm990_vm2, %v1339_v32  ;;  %v1000_v15 = vsel %vm990_vm2, %v646_v60, %v2579_v11  ;;  %v2670_v32 = vpack.i.bf16 %v762_v6, %v761_v28  ;;  %v2609_v34 = vunpack.i.h.bf16 %v2607_v38  ;;  %v660_v21 = vsel %vm636_vm1, 0.0, %v595_v30 }
 0x1d8   : > { %2651 = vrot.lane.b32.xlu0 %v2650_v44, %s2958_s19  ;;  %2656 = vrot.lane.b32.xlu1 %v2655_v45, %s2957_s18  ;;  %v2599_v45 = vunpack.i.h.bf16 %v3471_v53  ;;  %v3530_v5 = vmax.f32 %v504_v10, 0.0 }
 0x1d9   : > { %1678 = vmatmul.bf16.vlgmr.msrb.gmra.mxu2 %v1338_v26  ;;  %2666 = vrot.lane.b32.xlu2 %v2665_v52, %s2956_s12  ;;  %v2598_v26 = vunpack.i.l.bf16 %v3471_v53  ;;  %v999_v52 = vsel %vm990_vm2, %v645_v17, %v2578_v31  ;;  %v3536_v53 = vmax.f32 %v501_v24, 0.0  ;;  %v685_v17 = vrot.slane %v3508_v23, 1 }
 0x1da   : > { %v2587_v49 = vpop.permute.xlu0 %2586  ;;  %v2602_v62 = vpop.permute.xlu1 %2601  ;;  %v699_v8 = vrot.slane %v3530_v5, 1  ;;  %v2695_v59 = vpack.i.bf16 %v3508_v23, %v3530_v5 }
 0x1db   : > { %v2588_v54 = vunpack.i.l.bf16 %v2587_v49  ;;  %v2604_v63 = vunpack.i.h.bf16 %v2602_v62  ;;  %v2589_v18 = vunpack.i.h.bf16 %v2587_v49  ;;  %v2603_v42 = vunpack.i.l.bf16 %v2602_v62  ;;  %v470_v62 = vpop.f32.mrf.mxu0 }
 0x1dc   : > { %v698_v38 = vrot.slane %v3536_v53, 1  ;;  %v764_v36 = vsel %vm733_vm0, %v699_v8, 0.0 }
 0x1dd   : > { %v1001_v27 = vsel %vm990_vm2, %v647_v14, %v2588_v54  ;;  %v3512_v29 = vsel %vm1023_vm3, %v1000_v15, %v2604_v63  ;;  %v1014_v46 = vsel %vm990_vm2, %v660_v21, %v2589_v18  ;;  %v3543_v20 = vsel %vm1023_vm3, %v999_v52, %v2603_v42 }
 0x1de   : > { %v3517_v13 = vsel %vm1023_vm3, %v1001_v27, %v2608_v61  ;;  %v3540_v19 = vsel %vm1023_vm3, %v1014_v46, %v2609_v34  ;;  %v2680_v63 = vpack.i.bf16 %v3512_v29, %v3543_v20  ;;  %v583_v14 = vrot.slane %v3309_v7, 7 }
 0x1df   : > { %v2690_v44 = vpack.i.bf16 %v3517_v13, %v3512_v29  ;;  %v2675_v54 = vpack.i.bf16 %v749_v9, %v3540_v19  ;;  %v471_v15 = vadd.f32 %v3144_v35, %v470_v62  ;;  %v649_v18 = vsel %vm636_vm1, 0.0, %v584_v51 }
 0x1e0   : > { %2671 = vrot.lane.b32.xlu0 %v2670_v32, %s2957_s18  ;;  %2661 = vrot.lane.b32.xlu1 %v2660_v1, %s2957_s18  ;;  %v1342_v1 = vpack.c.bf16 %v2599_v45, %v2598_v26  ;;  %v763_v10 = vsel %vm733_vm0, %v698_v38, 0.0  ;;  %v648_v31 = vsel %vm636_vm1, 0.0, %v583_v14  ;;  %v2637_v14 = vpop.permute.xlu2 %2636 }
 0x1e1   : > { %2691 = vrot.lane.b32.xlu2 %v2690_v44, %s2957_s18  ;;  %v3567_v27 = vmax.f32 %v471_v15, 0.0  ;;  %v2700_v42 = vpack.i.bf16 %v764_v36, %v763_v10 }
 0x1e2   : > { %v2592_v12 = vpop.permute.xlu0 %2591 }
 0x1e3   : > { %v2594_v11 = vunpack.i.h.bf16 %v2592_v12  ;;  %v2593_v56 = vunpack.i.l.bf16 %v2592_v12  ;;  %v686_v51 = vrot.slane %v3567_v27, 1  ;;  %v473_v52 = vpop.f32.mrf.mxu0 }
 0x1e4   : > { %v474_v38 = vadd.f32 %v3144_v35, %v473_v52 }
 0x1e5   : > { %v1275_v30 = vsel %vm1272_vm4, %v3230_v0, %v2593_v56  ;;  %v1276_v60 = vsel %vm1272_vm4, %v3278_v47, %v2594_v11  ;;  %v1307_v61 = vsel %vm1023_vm3, %v2593_v56, %v2598_v26  ;;  %v1308_v49 = vsel %vm1023_vm3, %v2594_v11, %v2599_v45 }
 0x1e6   : > { %v1340_v28 = vpack.c.bf16 %v1276_v60, %v1275_v30  ;;  %v1341_v6 = vpack.c.bf16 %v1308_v49, %v1307_v61  ;;  %v2614_v0 = vunpack.i.h.bf16 %v2612_v41  ;;  %v2613_v47 = vunpack.i.l.bf16 %v2612_v41  ;;  %v505_v49 = vpop.f32.mrf.mxu2 }
 0x1e7   : > { %2370 = vmatmul.msk.bf16.gmra.mxu0 %vm990_vm2, %v1342_v1  ;;  %v2685_v26 = vpack.i.bf16 %v3536_v53, %v3495_v25  ;;  %v750_v56 = vsel %vm733_vm0, %v685_v17, 0.0  ;;  %v751_v1 = vsel %vm733_vm0, %v686_v51, 0.0  ;;  %v3596_v61 = vmax.f32 %v474_v38, 0.0 }
 0x1e8   : > { %2676 = vrot.lane.b32.xlu0 %v2675_v54, %s2957_s18  ;;  %2681 = vrot.lane.b32.xlu1 %v2680_v63, %s2958_s19  ;;  %v1003_v34 = vsel %vm990_vm2, %v649_v18, %v2614_v0  ;;  %v1002_v21 = vsel %vm990_vm2, %v648_v31, %v2613_v47  ;;  %v2725_v60 = vpack.i.bf16 %v751_v1, %v750_v56  ;;  %v2638_v56 = vunpack.i.l.bf16 %v2637_v14 }
 0x1e9   : > { %1594 = vmatmul.bf16.gmra.mxu1 %v1340_v28  ;;  %1683 = vmatmul.bf16.gmra.mxu2 %v1341_v6  ;;  %v506_v54 = vadd.f32 %v3144_v35, %v505_v49 }
 0x1ea   : > { %2696 = vrot.lane.b32.xlu2 %v2695_v59, %s2956_s12  ;;  %v2617_v7 = vpop.permute.xlu0 %2616 }
 0x1eb   : > { %v2619_v24 = vunpack.i.h.bf16 %v2617_v7  ;;  %v2618_v32 = vunpack.i.l.bf16 %v2617_v7  ;;  %v475_v62 = vpop.f32.mrf.mxu0  ;;  %v3605_v63 = vmax.f32 %v506_v54, 0.0 }
 0x1ed   : > { %v3573_v44 = vsel %vm1023_vm3, %v1002_v21, %v2618_v32  ;;  %v3576_v45 = vsel %vm1023_vm3, %v1003_v34, %v2619_v24  ;;  %v597_v21 = vrot.slane %v3372_v55, 7 }
 0x1ee   : > { %v2720_v46 = vpack.i.bf16 %v3576_v45, %v3573_v44  ;;  %v2710_v41 = vpack.i.bf16 %v3573_v44, %v3517_v13 }
 0x1f0   : > { %2701 = vrot.lane.b32.xlu0 %v2700_v42, %s2957_s18  ;;  %2686 = vrot.lane.b32.xlu1 %v2685_v26, %s2956_s12  ;;  %v598_v42 = vrot.slane %v3375_v58, 7 }
 0x1f2   : > { %2721 = vrot.lane.b32.xlu2 %v2720_v46, %s2957_s18  ;;  %v2622_v12 = vpop.permute.xlu0 %2621  ;;  %v663_v52 = vsel %vm636_vm1, 0.0, %v598_v42 }
 0x1f3   : > { %v2624_v9 = vunpack.i.h.bf16 %v2622_v12  ;;  %v2623_v11 = vunpack.i.l.bf16 %v2622_v12  ;;  %v2639_v12 = vunpack.i.h.bf16 %v2637_v14 }
 0x1f5   : > { %v1277_v8 = vsel %vm1272_vm4, %v3281_v48, %v2623_v11  ;;  %v1278_v59 = vsel %vm1272_vm4, %v3284_v50, %v2624_v9  ;;  %v2715_v48 = vpack.i.bf16 %v3596_v61, %v3567_v27  ;;  %v476_v50 = vadd.f32 %v3144_v35, %v475_v62 }
 0x1f6   : > { %v1343_v30 = vpack.c.bf16 %v1278_v59, %v1277_v8  ;;  %v687_v59 = vrot.slane %v3596_v61, 1 }
 0x1f7   : > { %v3607_v28 = vmax.f32 %v476_v50, 0.0  ;;  %v479_v50 = vadd.f32 %v3144_v35, %v3209_v33  ;;  %v586_v33 = vrot.slane %v3357_v40, 7 }
 0x1f8   : > { %2711 = vrot.lane.b32.xlu1 %v2710_v41, %s2958_s19  ;;  %v700_v41 = vrot.slane %v3605_v63, 1 }
 0x1f9   : > { %1599 = vmatmul.bf16.gmra.mxu1 %v1343_v30  ;;  %v2735_v6 = vpack.i.bf16 %v3607_v28, %v3605_v63 }
 0x1fa   : > { %2726 = vrot.lane.b32.xlu2 %v2725_v60, %s2957_s18  ;;  %v2647_v26 = vpop.permute.xlu0 %2646 }
 0x200   : > { %2716 = vrot.lane.b32.xlu1 %v2715_v48, %s2956_s12 }
 0x208   : > { %2736 = vrot.lane.b32.xlu1 %v2735_v6, %s2956_s12  ;;  %v585_v6 = vrot.slane %v3355_v39, 7 }
 0x22b   : > { %v3612_v15 = vpop.permute.xlu2 %2641 }
 0x22c   : > { %v2644_v0 = vunpack.i.h.bf16 %v3612_v15  ;;  %v2643_v47 = vunpack.i.l.bf16 %v3612_v15 }
 0x22e   : > { %v1369_v18 = vpack.c.bf16 %v2644_v0, %v2643_v47 }
 0x230   : > { %2379 = vmatmul.msk.bf16.vlgmr.msra.gmra.mxu3 %vm990_vm2, %v1369_v18 }
 0x233   : > { %v2667_v58 = vpop.permute.xlu2 %2666 }
 0x23a   : > { %v2627_v10 = vpop.permute.xlu1 %2626 }
 0x23b   : > { %v2629_v36 = vunpack.i.h.bf16 %v2627_v10  ;;  %v2628_v7 = vunpack.i.l.bf16 %v2627_v10  ;;  %v752_v10 = vsel %vm733_vm0, %v687_v59, 0.0 }
 0x23d   : > { %v1345_v31 = vpack.c.bf16 %v2629_v36, %v2628_v7  ;;  %v1309_v24 = vsel %vm1023_vm3, %v2623_v11, %v2628_v7  ;;  %v1310_v32 = vsel %vm1023_vm3, %v2624_v9, %v2629_v36  ;;  %v662_v11 = vsel %vm636_vm1, 0.0, %v597_v21 }
 0x23e   : > { %v1344_v34 = vpack.c.bf16 %v1310_v32, %v1309_v24  ;;  %v765_v36 = vsel %vm733_vm0, %v700_v41, 0.0  ;;  %v599_v7 = vrot.slane %v3469_v22, 7  ;;  %v600_v32 = vrot.slane %v3473_v57, 7 }
 0x23f   : > { %2371 = vmatmul.msk.bf16.gmra.mxu0 %vm990_vm2, %v1345_v31  ;;  %v2668_v21 = vunpack.i.l.bf16 %v2667_v58  ;;  %v2730_v42 = vpack.i.bf16 %v765_v36, %v752_v10  ;;  %v2649_v22 = vunpack.i.h.bf16 %v2647_v26 }
 0x240   : > { %1688 = vmatmul.bf16.gmra.mxu2 %v1344_v34  ;;  %v2648_v34 = vunpack.i.l.bf16 %v2647_v26  ;;  %v664_v40 = vsel %vm636_vm1, 0.0, %v599_v7  ;;  %v651_v26 = vsel %vm636_vm1, 0.0, %v586_v33 }
 0x241   : > { %v1005_v59 = vsel %vm990_vm2, %v651_v26, %v2649_v22 }
 0x242   : > { %v2632_v46 = vpop.permute.xlu1 %2631 }
 0x243   : > { %v2634_v17 = vunpack.i.h.bf16 %v2632_v46  ;;  %v2633_v51 = vunpack.i.l.bf16 %v2632_v46  ;;  %v2669_v46 = vunpack.i.h.bf16 %v2667_v58 }
 0x245   : > { %v1017_v9 = vsel %vm990_vm2, %v663_v52, %v2634_v17  ;;  %v1016_v1 = vsel %vm990_vm2, %v662_v11, %v2633_v51  ;;  %v2692_v17 = vpop.permute.xlu2 %2691  ;;  %v650_v51 = vsel %vm636_vm1, 0.0, %v585_v6 }
 0x246   : > { %v3631_v38 = vsel %vm1023_vm3, %v1016_v1, %v2638_v56  ;;  %v3634_v55 = vsel %vm1023_vm3, %v1017_v9, %v2639_v12  ;;  %v665_v1 = vsel %vm636_vm1, 0.0, %v600_v32  ;;  %v1004_v58 = vsel %vm990_vm2, %v650_v51, %v2648_v34 }
 0x247   : > { %v2705_v8 = vpack.i.bf16 %v3634_v55, %v3631_v38  ;;  %v1019_v41 = vsel %vm990_vm2, %v665_v1, %v2669_v46  ;;  %v2694_v10 = vunpack.i.h.bf16 %v2692_v17  ;;  %v2693_v36 = vunpack.i.l.bf16 %v2692_v17 }
 0x249   : > { %2706 = vrot.lane.b32.xlu0 %v2705_v8, %s2957_s18  ;;  %v1018_v8 = vsel %vm990_vm2, %v664_v40, %v2668_v21  ;;  %v1351_v34 = vpack.c.bf16 %v2694_v10, %v2693_v36  ;;  %v587_v40 = vrot.slane %v3495_v25, 7 }
 0x24a   : > { %v2652_v30 = vpop.permute.xlu0 %2651  ;;  %v2657_v60 = vpop.permute.xlu1 %2656 }
 0x24b   : > { %v2654_v49 = vunpack.i.h.bf16 %v2652_v30  ;;  %v2653_v62 = vunpack.i.l.bf16 %v2652_v30  ;;  %v3641_v48 = vunpack.i.h.bf16 %v2657_v60  ;;  %v2658_v54 = vunpack.i.l.bf16 %v2657_v60 }
 0x24c   : > { %v652_v1 = vsel %vm636_vm1, 0.0, %v587_v40 }
 0x24d   : > { %v1348_v14 = vpack.c.bf16 %v3641_v48, %v2658_v54  ;;  %v1279_v18 = vsel %vm1272_vm4, %v3346_v4, %v2653_v62  ;;  %v1280_v31 = vsel %vm1272_vm4, %v3440_v37, %v2654_v49  ;;  %v1311_v24 = vsel %vm1023_vm3, %v2653_v62, %v2658_v54 }
 0x24e   : > { %v1312_v35 = vsel %vm1023_vm3, %v2654_v49, %v3641_v48  ;;  %v1346_v39 = vpack.c.bf16 %v1280_v31, %v1279_v18  ;;  %v3660_v37 = vmax.f32 %v479_v50, 0.0  ;;  %v688_v18 = vrot.slane %v3607_v28, 1 }
 0x24f   : > { %2372 = vmatmul.msk.bf16.gmra.mxu0 %vm990_vm2, %v1348_v14  ;;  %v1347_v4 = vpack.c.bf16 %v1312_v35, %v1311_v24  ;;  %v3696_v24 = vpop.permute.xlu2 %2696 }
 0x250   : > { %1604 = vmatmul.bf16.gmra.mxu1 %v1346_v39  ;;  %v689_v14 = vrot.slane %v3660_v37, 1  ;;  %v2698_v25 = vunpack.i.l.bf16 %v3696_v24 }
 0x251   : > { %1693 = vmatmul.bf16.gmra.mxu2 %v1347_v4  ;;  %2731 = vrot.lane.b32.xlu0 %v2730_v42, %s2957_s18  ;;  %v753_v4 = vsel %vm733_vm0, %v688_v18, 0.0 }
 0x252   : > { %v2672_v52 = vpop.permute.xlu0 %2671  ;;  %v2662_v12 = vpop.permute.xlu1 %2661  ;;  %v754_v32 = vsel %vm733_vm0, %v689_v14, 0.0 }
 0x253   : > { %v2674_v56 = vunpack.i.h.bf16 %v2672_v52  ;;  %v2673_v57 = vunpack.i.l.bf16 %v2672_v52  ;;  %v2664_v11 = vunpack.i.h.bf16 %v2662_v12  ;;  %v2663_v9 = vunpack.i.l.bf16 %v2662_v12 }
 0x254   : > { %v601_v52 = vrot.slane %v3536_v53, 7  ;;  %v2755_v12 = vpack.i.bf16 %v754_v32, %v753_v4 }
 0x255   : > { %v3672_v30 = vsel %vm1023_vm3, %v1004_v58, %v2663_v9  ;;  %v3675_v60 = vsel %vm1023_vm3, %v1018_v8, %v2673_v57  ;;  %v3680_v62 = vsel %vm1023_vm3, %v1019_v41, %v2674_v56  ;;  %v3683_v54 = vsel %vm1023_vm3, %v1005_v59, %v2664_v11 }
 0x256   : > { %v2745_v49 = vpack.i.bf16 %v3672_v30, %v3576_v45  ;;  %v2740_v50 = vpack.i.bf16 %v3680_v62, %v3675_v60  ;;  %v2750_v6 = vpack.i.bf16 %v3683_v54, %v3672_v30  ;;  %v602_v57 = vrot.slane %v3530_v5, 7 }
 0x257   : > { %v666_v58 = vsel %vm636_vm1, 0.0, %v601_v52  ;;  %v2722_v8 = vpop.permute.xlu2 %2721  ;;  %v588_v52 = vrot.slane %v3508_v23, 7 }
 0x258   : > { %2746 = vrot.lane.b32.xlu2 %v2745_v49, %s2958_s19  ;;  %2741 = vrot.lane.b32.xlu1 %v2740_v50, %s2957_s18  ;;  %v667_v14 = vsel %vm636_vm1, 0.0, %v602_v57 }
 0x259   : > { %2751 = vrot.lane.b32.xlu0 %v2750_v6, %s2957_s18 }
 0x25a   : > { %v3694_v7 = vpop.permute.xlu0 %2676  ;;  %v2682_v31 = vpop.permute.xlu1 %2681 }
 0x25b   : > { %v2678_v35 = vunpack.i.l.bf16 %v3694_v7  ;;  %v2684_v33 = vunpack.i.h.bf16 %v2682_v31  ;;  %v2683_v39 = vunpack.i.l.bf16 %v2682_v31  ;;  %v2679_v53 = vunpack.i.h.bf16 %v3694_v7 }
 0x25c   : > { %v2723_v31 = vunpack.i.l.bf16 %v2722_v8 }
 0x25d   : > { %v1372_v21 = vpack.c.bf16 %v3641_v48, %v2678_v35  ;;  %v1282_v42 = vsel %vm1272_vm4, %v3543_v20, %v2684_v33  ;;  %v1313_v22 = vsel %vm1023_vm3, %v2683_v39, %v2693_v36  ;;  %v1314_v17 = vsel %vm1023_vm3, %v2684_v33, %v2694_v10 }
 0x25e   : > { %v2359_v46 = vpack.c.bf16 %v1282_v42, %v2683_v39  ;;  %v1350_v51 = vpack.c.bf16 %v1314_v17, %v1313_v22  ;;  %v1021_v10 = vsel %vm990_vm2, %v667_v14, %v2698_v25  ;;  %v2724_v36 = vunpack.i.h.bf16 %v2722_v8 }
 0x25f   : > { %2373 = vmatmul.msk.bf16.gmra.mxu0 %vm990_vm2, %v1351_v34  ;;  %2380 = vmatmul.msk.bf16.gmra.mxu3 %vm990_vm2, %v1372_v21 }
 0x260   : > { %806 = vrot.lane.b32.xlu2 %v3660_v37, %s2956_s12  ;;  %2360 = vmatmul.msk.bf16.gmra.mxu1 %vm3408_vm7, %v2359_v46  ;;  %v1354_v34 = vpack.c.bf16 %v2724_v36, %v2723_v31 }
 0x261   : > { %1698 = vmatmul.bf16.gmra.mxu2 %v1350_v51  ;;  %2756 = vrot.lane.b32.xlu0 %v2755_v12, %s2957_s18  ;;  %v2727_v51 = vpop.permute.xlu2 %2726  ;;  %v589_v12 = vrot.slane %v3567_v27, 7 }
 0x262   : > { %v2702_v20 = vpop.permute.xlu0 %2701  ;;  %v2687_v56 = vpop.permute.xlu1 %2686 }
 0x263   : > { %v2703_v11 = vunpack.i.l.bf16 %v2702_v20  ;;  %v2689_v9 = vunpack.i.h.bf16 %v2687_v56  ;;  %v2688_v26 = vunpack.i.l.bf16 %v2687_v56  ;;  %v2704_v59 = vunpack.i.h.bf16 %v2702_v20 }
 0x264   : > { %v2699_v20 = vunpack.i.h.bf16 %v3696_v24  ;;  %v2728_v56 = vunpack.i.l.bf16 %v2727_v51 }
 0x265   : > { %v1020_v41 = vsel %vm990_vm2, %v666_v58, %v2689_v9  ;;  %v1006_v49 = vsel %vm990_vm2, %v652_v1, %v2688_v26  ;;  %v3734_v33 = vsel %vm1023_vm3, %v1021_v10, %v2704_v59  ;;  %v654_v9 = vsel %vm636_vm1, 0.0, %v589_v12 }
 0x266   : > { %v1039_v50 = vsel %vm1023_vm3, %v1006_v49, %v2679_v53  ;;  %v3726_v5 = vsel %vm1023_vm3, %v1020_v41, %v2703_v11  ;;  %v653_v11 = vsel %vm636_vm1, 0.0, %v588_v52 }
 0x267   : > { %v2765_v6 = vpack.i.bf16 %v3726_v5, %v1039_v50  ;;  %v2760_v18 = vpack.i.bf16 %v1039_v50, %v3683_v54  ;;  %v1007_v26 = vsel %vm990_vm2, %v653_v11, %v2699_v20 }
 0x268   : > { %v3754_v23 = vsel %vm1023_vm3, %v1007_v26, %v2728_v56 }
 0x269   : > { %2766 = vrot.lane.b32.xlu2 %v2765_v6, %s2957_s18  ;;  %2761 = vrot.lane.b32.xlu1 %v2760_v18, %s2958_s19 }
 0x26a   : > { %1239 = vrot.lane.b32.xlu0 %v3734_v33, %s2957_s18  ;;  %v2712_v39 = vpop.permute.xlu1 %2711 }
 0x26b   : > { %v2714_v4 = vunpack.i.h.bf16 %v2712_v39  ;;  %v2713_v32 = vunpack.i.l.bf16 %v2712_v39 }
 0x26d   : > { %v1283_v21 = vsel %vm1272_vm4, %v3512_v29, %v2713_v32  ;;  %v1284_v42 = vsel %vm1272_vm4, %v3517_v13, %v2714_v4  ;;  %v1315_v22 = vsel %vm1023_vm3, %v2713_v32, %v2723_v31  ;;  %v1316_v17 = vsel %vm1023_vm3, %v2714_v4, %v2724_v36 }
 0x26e   : > { %v1352_v46 = vpack.c.bf16 %v1284_v42, %v1283_v21  ;;  %v1353_v40 = vpack.c.bf16 %v1316_v17, %v1315_v22  ;;  %v2729_v29 = vunpack.i.h.bf16 %v2727_v51 }
 0x26f   : > { %2374 = vmatmul.msk.bf16.gmra.mxu0 %vm990_vm2, %v1354_v34 }
 0x270   : > { %1614 = vmatmul.bf16.gmra.mxu1 %v1352_v46  ;;  %v2823_v46 = vld [vmem:[%s4191_s4] ss:$0 sm:$0xff] }
 0x271   : > { %1703 = vmatmul.bf16.gmra.mxu2 %v1353_v40  ;;  %v489_v17 = vadd.f32 %v2823_v46, %v3362_v43 }
 0x272   : > { %v2717_v13 = vpop.permute.xlu1 %2716 }
 0x273   : > { %v2718_v57 = vunpack.i.l.bf16 %v2717_v13  ;;  %v2719_v10 = vunpack.i.h.bf16 %v2717_v13  ;;  %v3800_v56 = vmax.f32 %v489_v17, 0.0 }
 0x275   : > { %v1008_v25 = vsel %vm990_vm2, %v654_v9, %v2718_v57 }
 0x276   : > { %v3757_v27 = vsel %vm1023_vm3, %v1008_v25, %v2729_v29  ;;  %v592_v25 = vrot.slane %v3660_v37, 7  ;;  %v2795_v37 = vpack.i.bf16 %v3540_v19, %v3459_v3 }
 0x277   : > { %v2770_v24 = vpack.i.bf16 %v3757_v27, %v3754_v23 }
 0x279   : > { %2771 = vrot.lane.b32.xlu1 %v2770_v24, %s2958_s19  ;;  %v591_v24 = vrot.slane %v3607_v28, 7 }
 0x27a   : > { %v2737_v18 = vpop.permute.xlu1 %2736 }
 0x27b   : > { %v2738_v36 = vunpack.i.l.bf16 %v2737_v18 }
 0x2b2   : > { %v2747_v53 = vpop.permute.xlu2 %2746 }
 0x2b3   : > { %v2749_v1 = vunpack.i.h.bf16 %v2747_v53  ;;  %v2748_v58 = vunpack.i.l.bf16 %v2747_v53  ;;  %v2739_v53 = vunpack.i.h.bf16 %v2737_v18 }
 0x2b5   : > { %v1285_v8 = vsel %vm1272_vm4, %v3573_v44, %v2748_v58  ;;  %v1286_v59 = vsel %vm1272_vm4, %v3576_v45, %v2749_v1  ;;  %v590_v44 = vrot.slane %v3596_v61, 7  ;;  %v603_v45 = vrot.slane %v3605_v63, 7 }
 0x2b6   : > { %v1355_v41 = vpack.c.bf16 %v1286_v59, %v1285_v8  ;;  %v656_v59 = vsel %vm636_vm1, 0.0, %v591_v24 }
 0x2b7   : > { %v655_v39 = vsel %vm636_vm1, 0.0, %v590_v44  ;;  %v668_v34 = vsel %vm636_vm1, 0.0, %v603_v45 }
 0x2b8   : > { %1619 = vmatmul.bf16.gmra.mxu1 %v1355_v41  ;;  %v1009_v21 = vsel %vm990_vm2, %v655_v39, %v2719_v10  ;;  %v1022_v42 = vsel %vm990_vm2, %v668_v34, %v2738_v36 }
 0x2ba   : > { %v807_v13 = vpop.permute.xlu2 %806 }
 0x2bb   : > { %v3766_v49 = vpop.permute.xlu0 %2706 }
 0x2bc   : > { %v2709_v50 = vunpack.i.h.bf16 %v3766_v49  ;;  %v2708_v6 = vunpack.i.l.bf16 %v3766_v49  ;;  %v2824_v49 = vld [vmem:[%s3093_s16] sm:$0xff] }
 0x2be   : > { %v1375_v14 = vpack.c.bf16 %v2709_v50, %v2708_v6 }
 0x2c0   : > { %2381 = vmatmul.msk.bf16.gmra.mxu3 %vm990_vm2, %v1375_v14  ;;  %v1010_v14 = vsel %vm990_vm2, %v656_v59, %v2739_v53  ;;  %v1590_v53 = vpop.f32.mrf.mxu1  ;;  %v1768_v59 = vpop.f32.mrf.mxu0 }
 0x2c3   : > { %v2732_v31 = vpop.permute.xlu0 %2731  ;;  %v3826_v45 = vpop.permute.xlu2 %2766 }
 0x2c4   : > { %v2734_v4 = vunpack.i.h.bf16 %v2732_v31  ;;  %v2733_v32 = vunpack.i.l.bf16 %v2732_v31  ;;  %v2769_v19 = vunpack.i.h.bf16 %v3826_v45  ;;  %v2768_v31 = vunpack.i.l.bf16 %v3826_v45 }
 0x2c6   : > { %v3782_v22 = vsel %vm1023_vm3, %v1022_v42, %v2734_v4  ;;  %v3785_v61 = vsel %vm1023_vm3, %v1009_v21, %v2733_v32  ;;  %v2810_v42 = vpack.i.bf16 %v3726_v5, %v3680_v62 }
 0x2c7   : > { %1241 = vrot.lane.b32.xlu0 %v3782_v22, %s2957_s18  ;;  %v2775_v63 = vpack.i.bf16 %v3785_v61, %v3757_v27 }
 0x2c9   : > { %2776 = vrot.lane.b32.xlu2 %v2775_v63, %s2957_s18  ;;  %v693_v63 = vrot.slane %v3800_v56, 1 }
 0x2ca   : > { %v3796_v51 = vpop.permute.xlu1 %2741 }
 0x2cb   : > { %v2744_v40 = vunpack.i.h.bf16 %v3796_v51  ;;  %v2743_v52 = vunpack.i.l.bf16 %v3796_v51  ;;  %v2752_v12 = vpop.permute.xlu0 %2751 }
 0x2cc   : > { %v2754_v20 = vunpack.i.h.bf16 %v2752_v12  ;;  %v2753_v29 = vunpack.i.l.bf16 %v2752_v12 }
 0x2cd   : > { %v1378_v57 = vpack.c.bf16 %v2744_v40, %v2743_v52 }
 0x2ce   : > { %v1357_v43 = vpack.c.bf16 %v2754_v20, %v2753_v29  ;;  %v1317_v11 = vsel %vm1023_vm3, %v2748_v58, %v2753_v29  ;;  %v1318_v9 = vsel %vm1023_vm3, %v2749_v1, %v2754_v20  ;;  %v657_v58 = vsel %vm636_vm1, 0.0, %v592_v25 }
 0x2cf   : > { %814 = vrot.lane.b32.xlu0 %v3800_v56, %s2956_s12  ;;  %v1356_v26 = vpack.c.bf16 %v1318_v9, %v1317_v11  ;;  %v1011_v44 = vsel %vm990_vm2, %v657_v58, %v807_v13  ;;  %v1360_v29 = vpack.c.bf16 %v3641_v48, %v2768_v31  ;;  %v1592_v58 = vpop.f32.mrf.mxu1  ;;  %s2163_s12 = sshll.u32 %s3998_s17, 4  ;;  %s2164_s12 = int_to_ptr.vmem [resolvable:$true] %s2163_s12 }
 0x2d0   : > { %2382 = vmatmul.msk.bf16.gmra.mxu3 %vm990_vm2, %v1378_v57  ;;  %2375 = vmatmul.msk.bf16.gmra.mxu0 %vm990_vm2, %v1357_v43 }
 0x2d1   : > { %1708 = vmatmul.bf16.gmra.mxu2 %v1356_v26 }
 0x2d3   : > { %v2757_v8 = vpop.permute.xlu0 %2756 }
 0x2d4   : > { %v2759_v1 = vunpack.i.h.bf16 %v2757_v8  ;;  %v2758_v41 = vunpack.i.l.bf16 %v2757_v8  ;;  %v1679_v8 = vpop.f32.mrf.mxu2 }
 0x2d6   : > { %v3821_v28 = vsel %vm1023_vm3, %v1010_v14, %v2758_v41  ;;  %v3824_v18 = vsel %vm1023_vm3, %v1011_v44, %v2759_v1  ;;  %v2444_v41 = vld [vmem:[%s4190_s3 + $0x8] sm:$0xff] }
 0x2d7   : > { %2796 = vrot.lane.b32.xlu0 %v2795_v37, %s2958_s19  ;;  %v2785_v10 = vpack.i.bf16 %v3824_v18, %v3821_v28  ;;  %v2780_v36 = vpack.i.bf16 %v3821_v28, %v3785_v61  ;;  %v2790_v43 = vpack.i.bf16 %v3456_v2, %v3824_v18  ;;  %1970 = vmatpush.bf16.msrb.mxu3 %v2444_v41 }
 0x2d9   : > { %2786 = vrot.lane.b32.xlu2 %v2785_v10, %s2957_s18  ;;  %2781 = vrot.lane.b32.xlu1 %v2780_v36, %s2958_s19 }
 0x2db   : > { %v2762_v39 = vpop.permute.xlu1 %2761 }
 0x2dc   : > { %v3837_v4 = vpop.permute.xlu0 %1239  ;;  %v2764_v32 = vunpack.i.h.bf16 %v2762_v39  ;;  %v2763_v34 = vunpack.i.l.bf16 %v2762_v39  ;;  %v1681_v1 = vpop.f32.mrf.mxu2 }
 0x2dd   : > { %v1381_v21 = vpack.c.bf16 %v3837_v4, %v2769_v19  ;;  %v1770_v39 = vpop.f32.mrf.mxu0 }
 0x2de   : > { %v1287_v46 = vsel %vm1272_vm4, %v3672_v30, %v2763_v34  ;;  %v1288_v17 = vsel %vm1272_vm4, %v3683_v54, %v2764_v32  ;;  %v1319_v12 = vsel %vm1023_vm3, %v2763_v34, %v2768_v31  ;;  %v1320_v20 = vsel %vm1023_vm3, %v2764_v32, %v3641_v48  ;;  %v1595_v34 = vpop.f32.mrf.mxu1 }
 0x2df   : > { %v1358_v13 = vpack.c.bf16 %v1288_v17, %v1287_v46  ;;  %v1359_v57 = vpack.c.bf16 %v1320_v20, %v1319_v12  ;;  %2811 = vrot.lane.b32.xlu0 %v2810_v42, %s2958_s19  ;;  %v758_v30 = vsel %vm733_vm0, %v693_v63, 0.0  ;;  %v2805_v54 = vpack.i.bf16 %v3675_v60, %v3634_v55 }
 0x2e0   : > { %2383 = vmatmul.msk.bf16.gmra.mxu3 %vm990_vm2, %v1381_v21  ;;  %2376 = vmatmul.msk.bf16.gmra.mxu0 %vm990_vm2, %v1360_v29 }
 0x2e1   : > { %1624 = vmatmul.bf16.gmra.mxu1 %v1358_v13  ;;  %2791 = vrot.lane.b32.xlu2 %v2790_v43, %s2958_s19 }
 0x2e2   : > { %942 = vrot.lane.b32.xlu1 %v758_v30, %s2957_s18  ;;  %1713 = vmatmul.bf16.gmra.mxu2 %v1359_v57  ;;  %v3883_v57 = vld [vmem:[%s4192_s5] ss:$0 sm:$0xff]  ;;  %s2165_s18 = sshll.u32 %s2162_s20, 4  ;;  %s2166_s18 = int_to_ptr.hbm [resolvable:$true] %s2165_s18 }
 0x2e3   : > { %s2900_s28 = sshra.s32 %s2166_s18, 4  ;;  %s2901_s28 = int_to_ptr.hbm [resolvable:$true] %s2900_s28 }
 0x2e4   : > { %v1684_v21 = vpop.f32.mrf.mxu2  ;;  %s2902_s21 = scalar_lea.hbm %s2901_s28, 256  ;;  %p2907_p0 = scmp.lt.s32.totalorder %s2901_s28, %s4194_s7 }
 0x2e5   : > { %v1773_v42 = vpop.f32.mrf.mxu0  ;;  %p2903_p6 = scmp.ne.s32.totalorder %s2901_s28, %s2902_s21 }
 0x2e6   : > { %v1597_v63 = vpop.f32.mrf.mxu1 }
 0x2e7   : > { %p2904_p12 = pnand %p2903_p6, %p3051_p10 }
 0x2e9   : > { %2806 = vrot.lane.b32.xlu2 %v2805_v54, %s2958_s19  ;;  %v1593_v54 = vadd.f32 %v3883_v57, %v1592_v58  ;;  %p2905_p13 = pneg %p2904_p12 }
 0x2eb   : > { %v2772_v11 = vpop.permute.xlu1 %2771 }
 0x2ec   : > { %v2774_v9 = vunpack.i.h.bf16 %v2772_v11  ;;  %v2773_v26 = vunpack.i.l.bf16 %v2772_v11  ;;  %v1686_v20 = vpop.f32.mrf.mxu2 }
 0x2ed   : > { %v1775_v30 = vpop.f32.mrf.mxu0 }
 0x2ee   : > { %v1290_v25 = vsel %vm1272_vm4, %v3754_v23, %v2774_v9  ;;  %v2443_v23 = vld [vmem:[%s4190_s3] sm:$0xff]  ;;  %v1600_v11 = vpop.f32.mrf.mxu1 }
 0x2ef   : > { %v2363_v24 = vpack.c.bf16 %v1290_v25, %v2773_v26  ;;  %1971 = vmatpush.bf16.msrb.mxu3 %v2443_v23  ;;  %v1682_v25 = vadd.f32 %v1681_v1, %v1593_v54 }
 0x2f1   : > { %2364 = vmatmul.msk.bf16.gmra.mxu1 %vm3408_vm7, %v2363_v24  ;;  %v1771_v41 = vadd.f32 %v1770_v39, %v1682_v25 }
 0x2f6   : > { %v1602_v23 = vpop.f32.mrf.mxu1 }
 0x323   : > { %v2777_v14 = vpop.permute.xlu2 %2776 }
 0x324   : > { %v2779_v44 = vunpack.i.h.bf16 %v2777_v14  ;;  %v2778_v37 = vunpack.i.l.bf16 %v2777_v14  ;;  %v3890_v14 = vpop.f32.mrf.mxu0 }
 0x326   : > { %v1363_v10 = vpack.c.bf16 %v2779_v44, %v2778_v37  ;;  %v1321_v36 = vsel %vm1023_vm3, %v2773_v26, %v2778_v37  ;;  %v1322_v31 = vsel %vm1023_vm3, %v2774_v9, %v2779_v44  ;;  %v1689_v9 = vpop.f32.mrf.mxu2  ;;  %v1591_v26 = vadd.f32 %v3883_v57, %v1590_v53 }
 0x327   : > { %v1362_v32 = vpack.c.bf16 %v1322_v31, %v1321_v36  ;;  %v1849_v37 = vmax.f32 %v1771_v41, 0.0  ;;  %v596_v53 = vrot.slane %v3800_v56, 7 }
 0x328   : > { %2377 = vmatmul.msk.bf16.gmra.mxu0 %vm990_vm2, %v1363_v10  ;;  %v1680_v24 = vadd.f32 %v1679_v8, %v1591_v26  ;;  %v1596_v8 = vadd.f32 %v3883_v57, %v1595_v34  ;;  %v1605_v26 = vpop.f32.mrf.mxu1 }
 0x329   : > { %1718 = vmatmul.bf16.gmra.mxu2 %v1362_v32  ;;  %v1598_v32 = vadd.f32 %v3883_v57, %v1597_v63 }
 0x32a   : > { %v1769_v44 = vadd.f32 %v1768_v59, %v1680_v24  ;;  %v1685_v41 = vadd.f32 %v1684_v21, %v1596_v8 }
 0x32b   : > { %v1687_v1 = vadd.f32 %v1686_v20, %v1598_v32  ;;  %v661_v20 = vsel %vm636_vm1, 0.0, %v596_v53  ;;  %v1603_v53 = vadd.f32 %v3883_v57, %v1602_v23  ;;  %v2815_v23 = vpack.i.bf16 %v3782_v22, %v3734_v33 }
 0x32c   : > { %v1848_v36 = vmax.f32 %v1769_v44, 0.0  ;;  %v1780_v39 = vpop.f32.mrf.mxu0 }
 0x32d   : > { %v1776_v34 = vadd.f32 %v1775_v30, %v1687_v1 }
 0x32e   : > { %v1691_v10 = vpop.f32.mrf.mxu2  ;;  %v1880_v31 = vpack.c.bf16 %v1849_v37, %v1848_v36  ;;  %v1774_v36 = vadd.f32 %v1773_v42, %v1685_v41 }
 0x330   : > { %v1850_v32 = vmax.f32 %v1774_v36, 0.0 }
 0x333   : > { %v2787_v46 = vpop.permute.xlu2 %2786 }
 0x334   : > { %v2789_v17 = vunpack.i.h.bf16 %v2787_v46  ;;  %v2788_v12 = vunpack.i.l.bf16 %v2787_v46  ;;  %v1783_v21 = vpop.f32.mrf.mxu0 }
 0x336   : > { %v1366_v29 = vpack.c.bf16 %v2789_v17, %v2788_v12  ;;  %v1694_v56 = vpop.f32.mrf.mxu2 }
 0x338   : > { %2378 = vmatmul.msk.bf16.gmra.mxu0 %vm990_vm2, %v1366_v29 }
 0x339   : > { %v3878_v13 = vpop.permute.xlu0 %1241 }
 0x33a   : > { %v1384_v43 = vpack.c.bf16 %v3641_v48, %v3878_v13 }
 0x33c   : > { %2384 = vmatmul.msk.bf16.gmra.mxu3 %vm990_vm2, %v1384_v43  ;;  %v1785_v41 = vpop.f32.mrf.mxu0 }
 0x33e   : > { %v1696_v8 = vpop.f32.mrf.mxu2 }
 0x341   : > { %v815_v44 = vpop.permute.xlu0 %814 }
 0x344   : > { %v1788_v36 = vpop.f32.mrf.mxu0 }
 0x34b   : > { %v2782_v58 = vpop.permute.xlu1 %2781 }
 0x34c   : > { %v2784_v46 = vunpack.i.h.bf16 %v2782_v58  ;;  %v2783_v29 = vunpack.i.l.bf16 %v2782_v58  ;;  %2393 = vmatmul.msk.bf16.vlgmr.msrb.gmra.mxu3 %vm990_vm2, %v1880_v31  ;;  %v1851_v31 = vmax.f32 %v1776_v34, 0.0  ;;  %v2797_v34 = vpop.permute.xlu0 %2796  ;;  %v1790_v7 = vpop.f32.mrf.mxu0 }
 0x34e   : > { %v1291_v59 = vsel %vm1272_vm4, %v3757_v27, %v2783_v29  ;;  %v1292_v43 = vsel %vm1272_vm4, %v3785_v61, %v2784_v46  ;;  %v1323_v54 = vsel %vm1023_vm3, %v2783_v29, %v2788_v12  ;;  %v1324_v63 = vsel %vm1023_vm3, %v2784_v46, %v2789_v17  ;;  %v2792_v12 = vpop.permute.xlu2 %2791  ;;  %v1607_v46 = vpop.f32.mrf.mxu1 }
 0x34f   : > { %v1364_v25 = vpack.c.bf16 %v1292_v43, %v1291_v59  ;;  %v1365_v24 = vpack.c.bf16 %v1324_v63, %v1323_v54  ;;  %v1015_v27 = vsel %vm990_vm2, %v661_v20, %v815_v44  ;;  %v2794_v58 = vunpack.i.h.bf16 %v2792_v12  ;;  %v1699_v44 = vpop.f32.mrf.mxu2 }
 0x350   : > { %v2793_v30 = vunpack.i.l.bf16 %v2792_v12  ;;  %v1881_v29 = vpack.c.bf16 %v1851_v31, %v1850_v32  ;;  %v1601_v54 = vadd.f32 %v3883_v57, %v1600_v11  ;;  %v1692_v63 = vadd.f32 %v1691_v10, %v1603_v53 }
 0x351   : > { %1634 = vmatmul.bf16.gmra.mxu1 %v1364_v25  ;;  %1723 = vmatmul.bf16.gmra.mxu2 %v1365_v24  ;;  %v1294_v1 = vsel %vm1272_vm4, %v3824_v18, %v2794_v58  ;;  %v1326_v43 = vsel %vm1023_vm3, %v2794_v58, %v2644_v0  ;;  %v3926_v18 = vpop.f32.mrf.mxu3  ;;  %v2799_v11 = vunpack.i.h.bf16 %v2797_v34  ;;  %v2798_v10 = vunpack.i.l.bf16 %v2797_v34 }
 0x352   : > { %v1293_v42 = vsel %vm1272_vm4, %v3821_v28, %v2793_v30  ;;  %v1325_v59 = vsel %vm1023_vm3, %v2793_v30, %v2643_v47  ;;  %v1690_v24 = vadd.f32 %v1689_v9, %v1601_v54  ;;  %v1781_v47 = vadd.f32 %v1780_v39, %v1692_v63 }
 0x353   : > { %v1367_v28 = vpack.c.bf16 %v1294_v1, %v1293_v42  ;;  %v1368_v25 = vpack.c.bf16 %v1326_v43, %v1325_v59  ;;  %v1608_v9 = vadd.f32 %v3883_v57, %v1607_v46  ;;  %v1295_v39 = vsel %vm1272_vm4, %v3456_v2, %v2798_v10 }
 0x354   : > { %v943_v37 = vpop.permute.xlu1 %942  ;;  %v1779_v0 = vadd.f32 %v3890_v14, %v1690_v24  ;;  %v1853_v22 = vmax.f32 %v1781_v47, 0.0  ;;  %v1296_v14 = vsel %vm1272_vm4, %v3459_v3, %v2799_v11  ;;  %v1327_v12 = vsel %vm1023_vm3, %v2798_v10, %v2678_v35  ;;  %v1793_v63 = vpop.f32.mrf.mxu0 }
 0x355   : > { %v3905_v61 = vsel %vm1023_vm3, %v1015_v27, %v943_v37  ;;  %v1606_v32 = vadd.f32 %v3883_v57, %v1605_v26  ;;  %v1697_v58 = vadd.f32 %v1696_v8, %v1608_v9  ;;  %v1370_v46 = vpack.c.bf16 %v1296_v14, %v1295_v39 }
 0x356   : > { %v2800_v17 = vpack.i.bf16 %v3631_v38, %v3905_v61  ;;  %v1610_v15 = vpop.f32.mrf.mxu1  ;;  %v1852_v20 = vmax.f32 %v1779_v0, 0.0 }
 0x357   : > { %v1701_v30 = vpop.f32.mrf.mxu2  ;;  %v1695_v53 = vadd.f32 %v1694_v56, %v1606_v32  ;;  %v1786_v2 = vadd.f32 %v1785_v41, %v1697_v58  ;;  %v1611_v56 = vadd.f32 %v3883_v57, %v1610_v15 }
 0x358   : > { %2801 = vrot.lane.b32.xlu1 %v2800_v17, %s2958_s19  ;;  %v1882_v27 = vpack.c.bf16 %v1853_v22, %v1852_v20  ;;  %v1328_v17 = vsel %vm1023_vm3, %v2799_v11, %v3641_v48 }
 0x359   : > { %v3929_v37 = vpop.f32.mrf.mxu3  ;;  %v1784_v3 = vadd.f32 %v1783_v21, %v1695_v53  ;;  %v1855_v1 = vmax.f32 %v1786_v2, 0.0 }
 0x35b   : > { %v1854_v59 = vmax.f32 %v1784_v3, 0.0 }
 0x35c   : > { %2394 = vmatmul.msk.bf16.gmra.mxu3 %vm990_vm2, %v1881_v29  ;;  %v1371_v29 = vpack.c.bf16 %v1328_v17, %v1327_v12  ;;  %v1795_v22 = vpop.f32.mrf.mxu0 }
 0x35e   : > { %v1612_v31 = vpop.f32.mrf.mxu1 }
 0x35f   : > { %v1704_v43 = vpop.f32.mrf.mxu2  ;;  %v1613_v54 = vadd.f32 %v3883_v57, %v1612_v31 }
 0x360   : > { %2816 = vrot.lane.b32.xlu1 %v2815_v23, %s2958_s19  ;;  %v1883_v23 = vpack.c.bf16 %v1855_v1, %v1854_v59  ;;  %s2906_s19 = scalar_lea.hbm %s4194_s7, 1024 }
 0x361   : > { %1639 = vmatmul.bf16.gmra.mxu1 %v1367_v28  ;;  %1728 = vmatmul.bf16.gmra.mxu2 %v1368_v25  ;;  %v3943_v42 = vpop.f32.mrf.mxu3  ;;  %v1702_v8 = vadd.f32 %v1701_v30, %v1613_v54  ;;  %v1700_v28 = vadd.f32 %v1699_v44, %v1611_v56  ;;  %p2908_p2 = scmp.lt.s32.totalorder %s2906_s19, %s2902_s21 }
 0x363   : > { %v1791_v24 = vadd.f32 %v1790_v7, %v1702_v8  ;;  %v1789_v41 = vadd.f32 %v1788_v36, %v1700_v28  ;;  %p2909_p3 = por %p2908_p2, %p2907_p0 }
 0x364   : > { %v1798_v14 = vpop.f32.mrf.mxu0 }
 0x365   : > { %v1857_v0 = vmax.f32 %v1791_v24, 0.0  ;;  %v1856_v34 = vmax.f32 %v1789_v41, 0.0  ;;  %p2910_p4 = pnand %p2909_p3, %p2905_p13 }
 0x366   : > { %v1615_v35 = vpop.f32.mrf.mxu1 }
 0x367   : > { %v1706_v21 = vpop.f32.mrf.mxu2  ;;  %v1884_v11 = vpack.c.bf16 %v1857_v0, %v1856_v34  ;;  %v1616_v15 = vadd.f32 %v3883_v57, %v1615_v35 }
 0x369   : > { %v3947_v26 = vpop.f32.mrf.mxu3  ;;  %v1705_v39 = vadd.f32 %v1704_v43, %v1616_v15 }
 0x36b   : > { %v1794_v17 = vadd.f32 %v1793_v63, %v1705_v39 }
 0x36c   : > { %2395 = vmatmul.msk.bf16.gmra.mxu3 %vm990_vm2, %v1882_v27 }
 0x36d   : > { %v1858_v58 = vmax.f32 %v1794_v17, 0.0 }
 0x36e   : > { %v1617_v25 = vpop.f32.mrf.mxu1 }
 0x36f   : > { %v1709_v10 = vpop.f32.mrf.mxu2  ;;  %v1618_v27 = vadd.f32 %v3883_v57, %v1617_v25 }
 0x371   : > { %1644 = vmatmul.bf16.gmra.mxu1 %v1370_v46  ;;  %1733 = vmatmul.bf16.gmra.mxu2 %v1371_v29  ;;  %v3950_v47 = vpop.f32.mrf.mxu3  ;;  %v1707_v9 = vadd.f32 %v1706_v21, %v1618_v27  ;;  %v1800_v29 = vpop.f32.mrf.mxu0 }
 0x373   : > { %v1796_v36 = vadd.f32 %v1795_v22, %v1707_v9 }
 0x375   : > { %v1859_v32 = vmax.f32 %v1796_v36, 0.0 }
 0x376   : > { %v1620_v20 = vpop.f32.mrf.mxu1 }
 0x377   : > { %v1711_v31 = vpop.f32.mrf.mxu2  ;;  %v1885_v46 = vpack.c.bf16 %v1859_v32, %v1858_v58  ;;  %v1621_v3 = vadd.f32 %v3883_v57, %v1620_v20 }
 0x379   : > { %v3955_v44 = vpop.f32.mrf.mxu3  ;;  %v1710_v35 = vadd.f32 %v1709_v10, %v1621_v3  ;;  %v1803_v54 = vpop.f32.mrf.mxu0 }
 0x37c   : > { %2396 = vmatmul.msk.bf16.gmra.mxu3 %vm990_vm2, %v1883_v23  ;;  %v1799_v23 = vadd.f32 %v1798_v14, %v1710_v35 }
 0x37e   : > { %v1622_v12 = vpop.f32.mrf.mxu1  ;;  %v1860_v63 = vmax.f32 %v1799_v23, 0.0 }
 0x37f   : > { %v1623_v2 = vadd.f32 %v3883_v57, %v1622_v12  ;;  %v1714_v1 = vpop.f32.mrf.mxu2 }
 0x381   : > { %v3957_v30 = vpop.f32.mrf.mxu3  ;;  %v1712_v7 = vadd.f32 %v1711_v31, %v1623_v2  ;;  %v1805_v34 = vpop.f32.mrf.mxu0 }
 0x383   : > { %v1801_v59 = vadd.f32 %v1800_v29, %v1712_v7 }
 0x385   : > { %v1861_v8 = vmax.f32 %v1801_v59, 0.0 }
 0x386   : > { %v1625_v53 = vpop.f32.mrf.mxu1 }
 0x387   : > { %v1716_v28 = vpop.f32.mrf.mxu2  ;;  %v1886_v25 = vpack.c.bf16 %v1861_v8, %v1860_v63  ;;  %v1626_v41 = vadd.f32 %v3883_v57, %v1625_v53 }
 0x389   : > { %v3962_v43 = vpop.f32.mrf.mxu3  ;;  %v1715_v20 = vadd.f32 %v1714_v1, %v1626_v41 }
 0x38b   : > { %v1804_v27 = vadd.f32 %v1803_v54, %v1715_v20 }
 0x38c   : > { %2397 = vmatmul.msk.bf16.gmra.mxu3 %vm990_vm2, %v1884_v11 }
 0x38d   : > { %v1862_v14 = vmax.f32 %v1804_v27, 0.0 }
 0x38e   : > { %v1627_v56 = vpop.f32.mrf.mxu1 }
 0x38f   : > { %v1628_v24 = vadd.f32 %v3883_v57, %v1627_v56 }
 0x391   : > { %v3966_v21 = vpop.f32.mrf.mxu3  ;;  %v1717_v0 = vadd.f32 %v1716_v28, %v1628_v24 }
 0x393   : > { %v1806_v10 = vadd.f32 %v1805_v34, %v1717_v0  ;;  %v2807_v34 = vpop.permute.xlu2 %2806 }
 0x394   : > { %v2809_v27 = vunpack.i.h.bf16 %v2807_v34 }
 0x395   : > { %v1863_v15 = vmax.f32 %v1806_v10, 0.0  ;;  %v2808_v10 = vunpack.i.l.bf16 %v2807_v34 }
 0x396   : > { %v1630_v22 = vpop.f32.mrf.mxu1 }
 0x397   : > { %v1887_v12 = vpack.c.bf16 %v1863_v15, %v1862_v14  ;;  %v1631_v32 = vadd.f32 %v3883_v57, %v1630_v22 }
 0x399   : > { %v3969_v9 = vpop.f32.mrf.mxu3 }
 0x39c   : > { %2398 = vmatmul.msk.bf16.gmra.mxu3 %vm990_vm2, %v1885_v46 }
 0x39e   : > { %v1632_v36 = vpop.f32.mrf.mxu1 }
 0x39f   : > { %v1633_v31 = vadd.f32 %v3883_v57, %v1632_v36 }
 0x3a5   : > { %v1808_v39 = vpop.f32.mrf.mxu0 }
 0x3ac   : > { %2399 = vmatmul.msk.bf16.gmra.mxu3 %vm990_vm2, %v1886_v25  ;;  %v1719_v11 = vpop.f32.mrf.mxu2  ;;  %v3990_v25 = vld [vmem:[%s4193_s6] ss:$0 sm:$0xff] }
 0x3ad   : > { %v1720_v29 = vadd.f32 %v1719_v11, %v1631_v32  ;;  %v1810_v53 = vpop.f32.mrf.mxu0  ;;  %v1300_v32 = vsel %vm1272_vm4, %v3634_v55, %v2809_v27 }
 0x3af   : > { %v1809_v3 = vadd.f32 %v1808_v39, %v1720_v29  ;;  %v1332_v29 = vsel %vm1023_vm3, %v2809_v27, %v2744_v40 }
 0x3b1   : > { %v1864_v35 = vmax.f32 %v1809_v3, 0.0 }
 0x3b4   : > { %v1721_v17 = vpop.f32.mrf.mxu2 }
 0x3b5   : > { %v1722_v58 = vadd.f32 %v1721_v17, %v1633_v31  ;;  %v1813_v22 = vpop.f32.mrf.mxu0  ;;  %v2825_v17 = vld [vmem:[%s3093_s16 + $0x8] sm:$0xff] }
 0x3b7   : > { %v1811_v2 = vadd.f32 %v1810_v53, %v1722_v58  ;;  %v1331_v58 = vsel %vm1023_vm3, %v2808_v10, %v2743_v52 }
 0x3b9   : > { %v1865_v7 = vmax.f32 %v1811_v2, 0.0 }
 0x3bb   : > { %v1888_v23 = vpack.c.bf16 %v1865_v7, %v1864_v35 }
 0x3bc   : > { %2400 = vmatmul.msk.bf16.gmra.mxu3 %vm990_vm2, %v1887_v12  ;;  %v1299_v12 = vsel %vm1272_vm4, %v3631_v38, %v2808_v10  ;;  %v2827_v10 = vld [vmem:[%s3093_s16 + $0x18] sm:$0xff] }
 0x3bd   : > { %v1376_v35 = vpack.c.bf16 %v1300_v32, %v1299_v12 }
 0x3bf   : > { %v3974_v46 = vpop.f32.mrf.mxu3 }
 0x3c7   : > { %v3976_v1 = vpop.f32.mrf.mxu3 }
 0x3ca   : > { %v2802_v59 = vpop.permute.xlu1 %2801 }
 0x3cb   : > { %v2804_v54 = vunpack.i.h.bf16 %v2802_v59  ;;  %v2803_v56 = vunpack.i.l.bf16 %v2802_v59  ;;  %v1377_v59 = vpack.c.bf16 %v1332_v29, %v1331_v58 }
 0x3cc   : > { %2401 = vmatmul.msk.bf16.gmra.mxu3 %vm990_vm2, %v1888_v23  ;;  %v1815_v23 = vpop.f32.mrf.mxu0 }
 0x3cd   : > { %v1298_v8 = vsel %vm1272_vm4, %v3905_v61, %v2804_v54  ;;  %v1329_v63 = vsel %vm1023_vm3, %v2803_v56, %v2708_v6  ;;  %v1330_v28 = vsel %vm1023_vm3, %v2804_v54, %v2709_v50 }
 0x3ce   : > { %v2367_v24 = vpack.c.bf16 %v1298_v8, %v2803_v56  ;;  %v1374_v41 = vpack.c.bf16 %v1330_v28, %v1329_v63  ;;  %v1635_v0 = vpop.f32.mrf.mxu1  ;;  %v2812_v8 = vpop.permute.xlu0 %2811  ;;  %v2826_v63 = vld [vmem:[%s3093_s16 + $0x10] sm:$0xff] }
 0x3cf   : > { %v1973_v61 = vpop.f32.mrf.mxu3  ;;  %v1636_v15 = vadd.f32 %v3883_v57, %v1635_v0 }
 0x3d0   : > { %2368 = vmatmul.msk.bf16.gmra.mxu1 %vm3408_vm7, %v2367_v24  ;;  %1738 = vmatmul.bf16.gmra.mxu2 %v1374_v41  ;;  %v1974_v6 = vadd.f32 %v3990_v25, %v1973_v61  ;;  %v2813_v61 = vunpack.i.l.bf16 %v2812_v8 }
 0x3d2   : > { %v2053_v50 = vadd.f32 %v2824_v49, %v1974_v6  ;;  %v2814_v6 = vunpack.i.h.bf16 %v2812_v8 }
 0x3d4   : > { %v2085_v20 = vmax.f32 %v2053_v50, 0.0  ;;  %v1724_v11 = vpop.f32.mrf.mxu2 }
 0x3d5   : > { %v1725_v36 = vadd.f32 %v1724_v11, %v1636_v15  ;;  %v1301_v11 = vsel %vm1272_vm4, %v3675_v60, %v2813_v61  ;;  %v1333_v15 = vsel %vm1023_vm3, %v2813_v61, %v2769_v19 }
 0x3d6   : > { %2117 = vst [vmem:[%s3998_s17] sm:$0xff] %v2085_v20  ;;  %v1637_v16 = vpop.f32.mrf.mxu1 }
 0x3d7   : > { %v1975_v39 = vpop.f32.mrf.mxu3  ;;  %v1638_v53 = vadd.f32 %v3883_v57, %v1637_v16  ;;  %v1814_v7 = vadd.f32 %v1813_v22, %v1725_v36  ;;  %v1302_v16 = vsel %vm1272_vm4, %v3680_v62, %v2814_v6 }
 0x3d8   : > { %v1976_v14 = vadd.f32 %v3990_v25, %v1975_v39  ;;  %v1334_v39 = vsel %vm1023_vm3, %v2814_v6, %v3837_v4 }
 0x3d9   : > { %v1866_v40 = vmax.f32 %v1814_v7, 0.0  ;;  %v1380_v32 = vpack.c.bf16 %v1334_v39, %v1333_v15 }
 0x3da   : > { %v2054_v31 = vadd.f32 %v2825_v17, %v1976_v14 }
 0x3dc   : > { %v2086_v2 = vmax.f32 %v2054_v31, 0.0  ;;  %v1726_v3 = vpop.f32.mrf.mxu2  ;;  %v1379_v31 = vpack.c.bf16 %v1302_v16, %v1301_v11 }
 0x3dd   : > { %v1727_v38 = vadd.f32 %v1726_v3, %v1638_v53  ;;  %v2817_v53 = vpop.permute.xlu1 %2816 }
 0x3de   : > { %2118 = vst [vmem:[%s3998_s17 + $0x8] sm:$0xff] %v2086_v2  ;;  %v1640_v55 = vpop.f32.mrf.mxu1  ;;  %v2828_v2 = vld [vmem:[%s3093_s16 + $0x20] sm:$0xff] }
 0x3df   : > { %v1816_v54 = vadd.f32 %v1815_v23, %v1727_v38  ;;  %v1978_v52 = vpop.f32.mrf.mxu3  ;;  %v1641_v49 = vadd.f32 %v3883_v57, %v1640_v55 }
 0x3e0   : > { %1654 = vmatmul.bf16.gmra.mxu1 %v1376_v35  ;;  %1743 = vmatmul.bf16.gmra.mxu2 %v1377_v59  ;;  %v1979_v51 = vadd.f32 %v3990_v25, %v1978_v52  ;;  %v2818_v35 = vunpack.i.l.bf16 %v2817_v53  ;;  %v2819_v59 = vunpack.i.h.bf16 %v2817_v53 }
 0x3e1   : > { %v1867_v56 = vmax.f32 %v1816_v54, 0.0 }
 0x3e2   : > { %v2055_v28 = vadd.f32 %v2826_v63, %v1979_v51  ;;  %v1303_v51 = vsel %vm1272_vm4, %v3726_v5, %v2818_v35  ;;  %v1304_v8 = vsel %vm1272_vm4, %v3734_v33, %v2819_v59  ;;  %v1335_v63 = vsel %vm1023_vm3, %v2818_v35, %v3878_v13 }
 0x3e3   : > { %v1889_v24 = vpack.c.bf16 %v1867_v56, %v1866_v40  ;;  %v2829_v40 = vld [vmem:[%s3093_s16 + $0x28] sm:$0xff]  ;;  %v1382_v5 = vpack.c.bf16 %v1304_v8, %v1303_v51 }
 0x3e4   : > { %v2087_v41 = vmax.f32 %v2055_v28, 0.0  ;;  %v1729_v0 = vpop.f32.mrf.mxu2  ;;  %v1336_v28 = vsel %vm1023_vm3, %v2819_v59, %v3641_v48  ;;  %v2837_v51 = vld [vmem:[%s3093_s16 + $0x68] sm:$0xff] }
 0x3e5   : > { %2402 = vmatmul.msk.bf16.gmra.mxu3 %vm990_vm2, %v1889_v24  ;;  %v1730_v20 = vadd.f32 %v1729_v0, %v1641_v49 }
 0x3e6   : > { %2119 = vst [vmem:[%s3998_s17 + $0x10] sm:$0xff] %v2087_v41  ;;  %v1642_v34 = vpop.f32.mrf.mxu1 }
 0x3e7   : > { %v1980_v50 = vpop.f32.mrf.mxu3  ;;  %v1643_v14 = vadd.f32 %v3883_v57, %v1642_v34  ;;  %v1819_v17 = vadd.f32 %v3926_v18, %v1730_v20  ;;  %v1383_v34 = vpack.c.bf16 %v1336_v28, %v1335_v63  ;;  %v2838_v28 = vld [vmem:[%s3093_s16 + $0x70] sm:$0xff] }
 0x3e8   : > { %v1981_v22 = vadd.f32 %v3990_v25, %v1980_v50 }
 0x3e9   : > { %v1868_v4 = vmax.f32 %v1819_v17, 0.0 }
 0x3ea   : > { %v2056_v27 = vadd.f32 %v2827_v10, %v1981_v22  ;;  %v2830_v22 = vld [vmem:[%s3093_s16 + $0x30] sm:$0xff] }
 0x3ec   : > { %v2088_v36 = vmax.f32 %v2056_v27, 0.0  ;;  %v1731_v12 = vpop.f32.mrf.mxu2  ;;  %v2831_v27 = vld [vmem:[%s3093_s16 + $0x38] sm:$0xff] }
 0x3ed   : > { %v1732_v60 = vadd.f32 %v1731_v12, %v1643_v14 }
 0x3ee   : > { %2120 = vst [vmem:[%s3998_s17 + $0x18] sm:$0xff] %v2088_v36  ;;  %v1645_v58 = vpop.f32.mrf.mxu1  ;;  %v2832_v36 = vld [vmem:[%s3093_s16 + $0x40] sm:$0xff] }
 0x3ef   : > { %v1821_v62 = vadd.f32 %v3929_v37, %v1732_v60  ;;  %v1983_v45 = vpop.f32.mrf.mxu3  ;;  %v1646_v37 = vadd.f32 %v3883_v57, %v1645_v58 }
 0x3f0   : > { %1659 = vmatmul.bf16.gmra.mxu1 %v1379_v31  ;;  %1748 = vmatmul.bf16.gmra.mxu2 %v1380_v32  ;;  %v1984_v19 = vadd.f32 %v3990_v25, %v1983_v45  ;;  %v2833_v32 = vld [vmem:[%s3093_s16 + $0x48] sm:$0xff] }
 0x3f1   : > { %v1869_v29 = vmax.f32 %v1821_v62, 0.0 }
 0x3f2   : > { %v2057_v3 = vadd.f32 %v2828_v2, %v1984_v19 }
 0x3f3   : > { %v1890_v18 = vpack.c.bf16 %v1869_v29, %v1868_v4  ;;  %v2834_v4 = vld [vmem:[%s3093_s16 + $0x50] sm:$0xff] }
 0x3f4   : > { %v2089_v7 = vmax.f32 %v2057_v3, 0.0  ;;  %v1734_v38 = vpop.f32.mrf.mxu2 }
 0x3f5   : > { %2403 = vmatmul.msk.bf16.gmra.mxu3 %vm990_vm2, %v1890_v18  ;;  %v1735_v52 = vadd.f32 %v1734_v38, %v1646_v37  ;;  %v2835_v18 = vld [vmem:[%s3093_s16 + $0x58] sm:$0xff]  ;;  %v2836_v37 = vld [vmem:[%s3093_s16 + $0x60] sm:$0xff] }
 0x3f6   : > { %2121 = vst [vmem:[%s3998_s17 + $0x20] sm:$0xff] %v2089_v7  ;;  %v1647_v55 = vpop.f32.mrf.mxu1 }
 0x3f7   : > { %v1985_v23 = vpop.f32.mrf.mxu3  ;;  %v1648_v24 = vadd.f32 %v3883_v57, %v1647_v55  ;;  %v1824_v61 = vadd.f32 %v3943_v42, %v1735_v52 }
 0x3f8   : > { %v1986_v54 = vadd.f32 %v3990_v25, %v1985_v23 }
 0x3f9   : > { %v1870_v49 = vmax.f32 %v1824_v61, 0.0 }
 0x3fa   : > { %v2058_v56 = vadd.f32 %v2829_v40, %v1986_v54 }
 0x3fc   : > { %v2090_v41 = vmax.f32 %v2058_v56, 0.0  ;;  %v1736_v0 = vpop.f32.mrf.mxu2 }
 0x3fd   : > { %v1737_v6 = vadd.f32 %v1736_v0, %v1648_v24 }
 0x3fe   : > { %2122 = vst [vmem:[%s3998_s17 + $0x28] sm:$0xff] %v2090_v41 }
 0x3ff   : > { %v1826_v33 = vadd.f32 %v3947_v26, %v1737_v6  ;;  %v1988_v13 = vpop.f32.mrf.mxu3  ;;  %v2839_v6 = vld [vmem:[%s3093_s16 + $0x78] sm:$0xff] }
 0x400   : > { %1664 = vmatmul.bf16.gmra.mxu1 %v1382_v5  ;;  %1753 = vmatmul.bf16.gmra.mxu2 %v1383_v34  ;;  %v1989_v48 = vadd.f32 %v3990_v25, %v1988_v13 }
 0x401   : > { %v1871_v50 = vmax.f32 %v1826_v33, 0.0 }
 0x402   : > { %v2059_v20 = vadd.f32 %v2830_v22, %v1989_v48 }
 0x403   : > { %v1891_v42 = vpack.c.bf16 %v1871_v50, %v1870_v49  ;;  %v2840_v49 = vld [vmem:[%s3093_s16 + $0x80] sm:$0xff] }
 0x404   : > { %v2091_v11 = vmax.f32 %v2059_v20, 0.0 }
 0x405   : > { %2404 = vmatmul.msk.bf16.gmra.mxu3 %vm990_vm2, %v1891_v42 }
 0x406   : > { %2123 = vst [vmem:[%s3998_s17 + $0x30] sm:$0xff] %v2091_v11 }
 0x407   : > { %v1990_v10 = vpop.f32.mrf.mxu3 }
 0x408   : > { %v1991_v26 = vadd.f32 %v3990_v25, %v1990_v10 }
 0x40a   : > { %v2060_v16 = vadd.f32 %v2831_v27, %v1991_v26 }
 0x40c   : > { %v2092_v15 = vmax.f32 %v2060_v16, 0.0 }
 0x40e   : > { %2124 = vst [vmem:[%s3998_s17 + $0x38] sm:$0xff] %v2092_v15  ;;  %v2841_v15 = vld [vmem:[%s3093_s16 + $0x88] sm:$0xff] }
 0x40f   : > { %v1993_v39 = vpop.f32.mrf.mxu3 }
 0x410   : > { %v1994_v14 = vadd.f32 %v3990_v25, %v1993_v39 }
 0x412   : > { %v2061_v12 = vadd.f32 %v2832_v36, %v1994_v14 }
 0x414   : > { %v2093_v17 = vmax.f32 %v2061_v12, 0.0 }
 0x416   : > { %2125 = vst [vmem:[%s3998_s17 + $0x40] sm:$0xff] %v2093_v17 }
 0x417   : > { %v1995_v60 = vpop.f32.mrf.mxu3 }
 0x418   : > { %v1996_v31 = vadd.f32 %v3990_v25, %v1995_v60 }
 0x41a   : > { %v2062_v58 = vadd.f32 %v2833_v32, %v1996_v31 }
 0x41c   : > { %v2094_v62 = vmax.f32 %v2062_v58, 0.0 }
 0x41e   : > { %2126 = vst [vmem:[%s3998_s17 + $0x48] sm:$0xff] %v2094_v62 }
 0x41f   : > { %v1998_v45 = vpop.f32.mrf.mxu3 }
 0x420   : > { %v1999_v19 = vadd.f32 %v3990_v25, %v1998_v45 }
 0x422   : > { %v2063_v29 = vadd.f32 %v2834_v4, %v1999_v19 }
 0x424   : > { %v2095_v53 = vmax.f32 %v2063_v29, 0.0 }
 0x426   : > { %2127 = vst [vmem:[%s3998_s17 + $0x50] sm:$0xff] %v2095_v53 }
 0x427   : > { %v2000_v2 = vpop.f32.mrf.mxu3 }
 0x428   : > { %v2001_v3 = vadd.f32 %v3990_v25, %v2000_v2 }
 0x42a   : > { %v2064_v7 = vadd.f32 %v2835_v18, %v2001_v3  ;;  %v2842_v18 = vld [vmem:[%s3093_s16 + $0x90] sm:$0xff] }
 0x42c   : > { %v2096_v38 = vmax.f32 %v2064_v7, 0.0 }
 0x42e   : > { %2128 = vst [vmem:[%s3998_s17 + $0x58] sm:$0xff] %v2096_v38 }
 0x42f   : > { %v2003_v35 = vpop.f32.mrf.mxu3 }
 0x430   : > { %v2004_v59 = vadd.f32 %v3990_v25, %v2003_v35 }
 0x432   : > { %v2065_v23 = vadd.f32 %v2836_v37, %v2004_v59 }
 0x434   : > { %v2097_v55 = vmax.f32 %v2065_v23, 0.0 }
 0x436   : > { %2129 = vst [vmem:[%s3998_s17 + $0x60] sm:$0xff] %v2097_v55 }
 0x437   : > { %v2005_v54 = vpop.f32.mrf.mxu3 }
 0x438   : > { %v2006_v52 = vadd.f32 %v3990_v25, %v2005_v54 }
 0x43a   : > { %v2066_v40 = vadd.f32 %v2837_v51, %v2006_v52 }
 0x43c   : > { %v2098_v56 = vmax.f32 %v2066_v40, 0.0 }
 0x43e   : > { %2130 = vst [vmem:[%s3998_s17 + $0x68] sm:$0xff] %v2098_v56  ;;  %v2843_v56 = vld [vmem:[%s3093_s16 + $0x98] sm:$0xff] }
 0x43f   : > { %v2008_v8 = vpop.f32.mrf.mxu3 }
 0x440   : > { %v2009_v63 = vadd.f32 %v3990_v25, %v2008_v8 }
 0x442   : > { %v2067_v24 = vadd.f32 %v2838_v28, %v2009_v63 }
 0x444   : > { %v2099_v41 = vmax.f32 %v2067_v24, 0.0 }
 0x446   : > { %2131 = vst [vmem:[%s3998_s17 + $0x70] sm:$0xff] %v2099_v41 }
 0x447   : > { %v2010_v0 = vpop.f32.mrf.mxu3 }
 0x448   : > { %v2011_v61 = vadd.f32 %v3990_v25, %v2010_v0 }
 0x44a   : > { %v2068_v5 = vadd.f32 %v2839_v6, %v2011_v61 }
 0x44c   : > { %v2100_v34 = vmax.f32 %v2068_v5, 0.0  ;;  %v2844_v5 = vld [vmem:[%s3093_s16 + $0xa0] sm:$0xff] }
 0x44d   : > { %v1650_v33 = vpop.f32.mrf.mxu1 }
 0x44e   : > { %2132 = vst [vmem:[%s3998_s17 + $0x78] sm:$0xff] %v2100_v34  ;;  %v1651_v11 = vadd.f32 %v3883_v57, %v1650_v33 }
 0x44f   : > { %v2013_v13 = vpop.f32.mrf.mxu3 }
 0x450   : > { %v2014_v48 = vadd.f32 %v3990_v25, %v2013_v13 }
 0x452   : > { %v2069_v50 = vadd.f32 %v2840_v49, %v2014_v48 }
 0x453   : > { %v1739_v22 = vpop.f32.mrf.mxu2 }
 0x454   : > { %v2101_v20 = vmax.f32 %v2069_v50, 0.0  ;;  %v1740_v10 = vadd.f32 %v1739_v22, %v1651_v11 }
 0x455   : > { %v1652_v42 = vpop.f32.mrf.mxu1 }
 0x456   : > { %2133 = vst [vmem:[%s3998_s17 + $0x80] sm:$0xff] %v2101_v20  ;;  %v1653_v16 = vadd.f32 %v3883_v57, %v1652_v42  ;;  %v1829_v36 = vadd.f32 %v3950_v47, %v1740_v10 }
 0x457   : > { %v2015_v26 = vpop.f32.mrf.mxu3 }
 0x458   : > { %v2016_v27 = vadd.f32 %v3990_v25, %v2015_v26  ;;  %v1872_v32 = vmax.f32 %v1829_v36, 0.0  ;;  %v2845_v26 = vld [vmem:[%s3093_s16 + $0xa8] sm:$0xff] }
 0x45a   : > { %v2070_v39 = vadd.f32 %v2841_v15, %v2016_v27 }
 0x45b   : > { %v1741_v14 = vpop.f32.mrf.mxu2 }
 0x45c   : > { %v1742_v12 = vadd.f32 %v1741_v14, %v1653_v16  ;;  %v2102_v17 = vmax.f32 %v2070_v39, 0.0 }
 0x45d   : > { %v1655_v60 = vpop.f32.mrf.mxu1 }
 0x45e   : > { %v1831_v31 = vadd.f32 %v3955_v44, %v1742_v12  ;;  %2134 = vst [vmem:[%s3998_s17 + $0x88] sm:$0xff] %v2102_v17  ;;  %v1656_v4 = vadd.f32 %v3883_v57, %v1655_v60  ;;  %v2846_v60 = vld [vmem:[%s3093_s16 + $0xb0] sm:$0xff] }
 0x460   : > { %v1873_v58 = vmax.f32 %v1831_v31, 0.0 }
 0x462   : > { %v1892_v62 = vpack.c.bf16 %v1873_v58, %v1872_v32 }
 0x463   : > { %v1744_v45 = vpop.f32.mrf.mxu2 }
 0x464   : > { %2405 = vmatmul.msk.bf16.gmra.mxu3 %vm990_vm2, %v1892_v62  ;;  %v1745_v29 = vadd.f32 %v1744_v45, %v1656_v4 }
 0x465   : > { %v1657_v19 = vpop.f32.mrf.mxu1 }
 0x466   : > { %v1658_v47 = vadd.f32 %v3883_v57, %v1657_v19  ;;  %v1834_v44 = vadd.f32 %v3957_v30, %v1745_v29 }
 0x468   : > { %v2018_v53 = vpop.f32.mrf.mxu3  ;;  %v1874_v23 = vmax.f32 %v1834_v44, 0.0 }
 0x469   : > { %v2019_v2 = vadd.f32 %v3990_v25, %v2018_v53  ;;  %v2847_v53 = vld [vmem:[%s3093_s16 + $0xb8] sm:$0xff] }
 0x46b   : > { %v1746_v3 = vpop.f32.mrf.mxu2  ;;  %v2071_v7 = vadd.f32 %v2842_v18, %v2019_v2 }
 0x46c   : > { %v1747_v38 = vadd.f32 %v1746_v3, %v1658_v47  ;;  %v2848_v3 = vld [vmem:[%s3093_s16 + $0xc0] sm:$0xff] }
 0x46d   : > { %v1660_v35 = vpop.f32.mrf.mxu1  ;;  %v2103_v59 = vmax.f32 %v2071_v7, 0.0 }
 0x46e   : > { %v1836_v37 = vadd.f32 %v3962_v43, %v1747_v38  ;;  %v1661_v63 = vadd.f32 %v3883_v57, %v1660_v35  ;;  %v2849_v35 = vld [vmem:[%s3093_s16 + $0xc8] sm:$0xff] }
 0x46f   : > { %2135 = vst [vmem:[%s3998_s17 + $0x90] sm:$0xff] %v2103_v59 }
 0x470   : > { %v1875_v55 = vmax.f32 %v1836_v37, 0.0  ;;  %v2020_v54 = vpop.f32.mrf.mxu3 }
 0x471   : > { %v2021_v51 = vadd.f32 %v3990_v25, %v2020_v54  ;;  %v2850_v54 = vld [vmem:[%s3093_s16 + $0xd0] sm:$0xff] }
 0x472   : > { %v1893_v52 = vpack.c.bf16 %v1875_v55, %v1874_v23 }
 0x473   : > { %v1749_v40 = vpop.f32.mrf.mxu2  ;;  %v2072_v8 = vadd.f32 %v2843_v56, %v2021_v51 }
 0x474   : > { %2406 = vmatmul.msk.bf16.gmra.mxu3 %vm990_vm2, %v1893_v52  ;;  %v1750_v43 = vadd.f32 %v1749_v40, %v1661_v63 }
 0x475   : > { %v1662_v30 = vpop.f32.mrf.mxu1  ;;  %v2104_v28 = vmax.f32 %v2072_v8, 0.0  ;;  %v2851_v8 = vld [vmem:[%s3093_s16 + $0xd8] sm:$0xff] }
 0x476   : > { %v1663_v41 = vadd.f32 %v3883_v57, %v1662_v30  ;;  %v1839_v6 = vadd.f32 %v3966_v21, %v1750_v43 }
 0x477   : > { %2136 = vst [vmem:[%s3998_s17 + $0x98] sm:$0xff] %v2104_v28 }
 0x478   : > { %v2023_v24 = vpop.f32.mrf.mxu3  ;;  %v1876_v50 = vmax.f32 %v1839_v6, 0.0 }
 0x479   : > { %v2024_v0 = vadd.f32 %v3990_v25, %v2023_v24  ;;  %v2852_v24 = vld [vmem:[%s3093_s16 + $0xe0] sm:$0xff] }
 0x47b   : > { %v1751_v61 = vpop.f32.mrf.mxu2  ;;  %v2073_v34 = vadd.f32 %v2844_v5, %v2024_v0  ;;  %v2853_v5 = vld [vmem:[%s3093_s16 + $0xe8] sm:$0xff] }
 0x47c   : > { %v1752_v33 = vadd.f32 %v1751_v61, %v1663_v41 }
 0x47d   : > { %v1665_v13 = vpop.f32.mrf.mxu1  ;;  %v2105_v48 = vmax.f32 %v2073_v34, 0.0 }
 0x47e   : > { %v1841_v49 = vadd.f32 %v3969_v9, %v1752_v33  ;;  %v1666_v21 = vadd.f32 %v3883_v57, %v1665_v13 }
 0x47f   : > { %2137 = vst [vmem:[%s3998_s17 + $0xa0] sm:$0xff] %v2105_v48 }
 0x480   : > { %v1877_v22 = vmax.f32 %v1841_v49, 0.0  ;;  %v2025_v20 = vpop.f32.mrf.mxu3  ;;  %v2854_v49 = vld [vmem:[%s3093_s16 + $0xf0] sm:$0xff] }
 0x481   : > { %v2026_v11 = vadd.f32 %v3990_v25, %v2025_v20 }
 0x482   : > { %v1894_v42 = vpack.c.bf16 %v1877_v22, %v1876_v50 }
 0x483   : > { %v1754_v10 = vpop.f32.mrf.mxu2  ;;  %v2074_v27 = vadd.f32 %v2845_v26, %v2026_v11  ;;  %v2855_v11 = vld [vmem:[%s3093_s16 + $0xf8] sm:$0xff] }
 0x484   : > { %2407 = vmatmul.msk.bf16.gmra.mxu3 %vm990_vm2, %v1894_v42  ;;  %v1755_v9 = vadd.f32 %v1754_v10, %v1666_v21 }
 0x485   : > { %v2106_v16 = vmax.f32 %v2074_v27, 0.0  ;;  %v1667_v15 = vpop.f32.mrf.mxu1 }
 0x486   : > { %v1668_v14 = vadd.f32 %v3883_v57, %v1667_v15  ;;  %v1844_v17 = vadd.f32 %v3974_v46, %v1755_v9 }
 0x487   : > { %2138 = vst [vmem:[%s3998_s17 + $0xa8] sm:$0xff] %v2106_v16 }
 0x488   : > { %v2028_v39 = vpop.f32.mrf.mxu3  ;;  %v1878_v45 = vmax.f32 %v1844_v17, 0.0 }
 0x489   : > { %v2029_v36 = vadd.f32 %v3990_v25, %v2028_v39 }
 0x48b   : > { %v1756_v12 = vpop.f32.mrf.mxu2  ;;  %v2075_v31 = vadd.f32 %v2846_v60, %v2029_v36 }
 0x48c   : > { %v1757_v32 = vadd.f32 %v1756_v12, %v1668_v14 }
 0x48d   : > { %v2107_v58 = vmax.f32 %v2075_v31, 0.0 }
 0x48e   : > { %v1846_v62 = vadd.f32 %v3976_v1, %v1757_v32 }
 0x48f   : > { %2139 = vst [vmem:[%s3998_s17 + $0xb0] sm:$0xff] %v2107_v58 }
 0x490   : > { %v1879_v19 = vmax.f32 %v1846_v62, 0.0  ;;  %v2030_v4 = vpop.f32.mrf.mxu3 }
 0x491   : > { %v2031_v29 = vadd.f32 %v3990_v25, %v2030_v4 }
 0x492   : > { %v1895_v57 = vpack.c.bf16 %v1879_v19, %v1878_v45 }
 0x493   : > { %v2076_v46 = vadd.f32 %v2847_v53, %v2031_v29 }
 0x494   : > { %2408 = vmatmul.msk.bf16.gmra.mxu3 %vm990_vm2, %v1895_v57 }
 0x495   : > { %v2108_v47 = vmax.f32 %v2076_v46, 0.0 }
 0x497   : > { %2140 = vst [vmem:[%s3998_s17 + $0xb8] sm:$0xff] %v2108_v47 }
 0x4e7   : > { %v2033_v2 = vpop.f32.mrf.mxu3 }
 0x4e8   : > { %v2034_v1 = vadd.f32 %v3990_v25, %v2033_v2 }
 0x4ea   : > { %v2077_v44 = vadd.f32 %v2848_v3, %v2034_v1 }
 0x4ec   : > { %v2109_v18 = vmax.f32 %v2077_v44, 0.0 }
 0x4ee   : > { %2141 = vst [vmem:[%s3998_s17 + $0xc0] sm:$0xff] %v2109_v18 }
 0x4ef   : > { %v2035_v7 = vpop.f32.mrf.mxu3 }
 0x4f0   : > { %v2036_v38 = vadd.f32 %v3990_v25, %v2035_v7 }
 0x4f2   : > { %v2078_v59 = vadd.f32 %v2849_v35, %v2036_v38 }
 0x4f4   : > { %v2110_v37 = vmax.f32 %v2078_v59, 0.0 }
 0x4f6   : > { %2142 = vst [vmem:[%s3998_s17 + $0xc8] sm:$0xff] %v2110_v37 }
 0x4f7   : > { %v2038_v23 = vpop.f32.mrf.mxu3 }
 0x4f8   : > { %v2039_v55 = vadd.f32 %v3990_v25, %v2038_v23 }
 0x4fa   : > { %v2079_v52 = vadd.f32 %v2850_v54, %v2039_v55 }
 0x4fc   : > { %v2111_v51 = vmax.f32 %v2079_v52, 0.0 }
 0x4fe   : > { %2143 = vst [vmem:[%s3998_s17 + $0xd0] sm:$0xff] %v2111_v51 }
 0x4ff   : > { %v2040_v40 = vpop.f32.mrf.mxu3 }
 0x500   : > { %v2041_v56 = vadd.f32 %v3990_v25, %v2040_v40 }
 0x502   : > { %v2080_v30 = vadd.f32 %v2851_v8, %v2041_v56 }
 0x504   : > { %v2112_v63 = vmax.f32 %v2080_v30, 0.0 }
 0x506   : > { %2144 = vst [vmem:[%s3998_s17 + $0xd8] sm:$0xff] %v2112_v63 }
 0x507   : > { %v2043_v28 = vpop.f32.mrf.mxu3 }
 0x508   : > { %v2044_v43 = vadd.f32 %v3990_v25, %v2043_v28 }
 0x50a   : > { %v2081_v41 = vadd.f32 %v2852_v24, %v2044_v43 }
 0x50c   : > { %v2113_v0 = vmax.f32 %v2081_v41, 0.0 }
 0x50e   : > { %2145 = vst [vmem:[%s3998_s17 + $0xe0] sm:$0xff] %v2113_v0 }
 0x50f   : > { %v2045_v61 = vpop.f32.mrf.mxu3 }
 0x510   : > { %v2046_v6 = vadd.f32 %v3990_v25, %v2045_v61 }
 0x512   : > { %v2082_v34 = vadd.f32 %v2853_v5, %v2046_v6 }
 0x514   : > { %v2114_v33 = vmax.f32 %v2082_v34, 0.0 }
 0x516   : > { %2146 = vst [vmem:[%s3998_s17 + $0xe8] sm:$0xff] %v2114_v33 }
 0x517   : > { %v2048_v13 = vpop.f32.mrf.mxu3 }
 0x518   : > { %v2049_v48 = vadd.f32 %v3990_v25, %v2048_v13 }
 0x51a   : > { %v2083_v50 = vadd.f32 %v2854_v49, %v2049_v48 }
 0x51c   : > { %v2115_v22 = vmax.f32 %v2083_v50, 0.0 }
 0x51e   : > { %2147 = vst [vmem:[%s3998_s17 + $0xf0] sm:$0xff] %v2115_v22 }
 0x51f   : > { %v2050_v20 = vpop.f32.mrf.mxu3 }
 0x520   : > { %v2051_v42 = vadd.f32 %v3990_v25, %v2050_v20 }
 0x522   : > { %v2084_v10 = vadd.f32 %v2855_v11, %v2051_v42 }
 0x524   : > { %v2116_v26 = vmax.f32 %v2084_v10, 0.0 }
 0x526   : > { %2148 = vst [vmem:[%s3998_s17 + $0xf8] sm:$0xff] %v2116_v26 }
 0x527   : > { %2913 = shalt.err (!%p2910_p4)
}
 0x528   : > { %s2960_s22 = smov 128   ;;  %s2961_s16 = smov 8  }
 0x529   : > { %2467 = dma.vmem_to_hbm [thread:$0]  (%p3051_p10), %s2164_s12, 4096, %s2166_s18, %s2150_s9, %s2960_s22, %s2960_s22, %s2961_s16  }
 0x52a PF: > { %p2478_p5 = scmp.ge.s32.totalorder %s2952_s27, 2  ;;  %s2180_s17 = sand.u32 1, %s2940_s24  }
 0x52b   : > { %s2181_s11 = scalar_lea.sflag [#allocation4], %s2180_s17 }
 0x52c   : > { %p2474_p7 = pnand %p2478_p5, %p3055_p11 }
 0x52e   : > { %p2475_p8 = pneg %p2474_p7 }
 0x530   : > { %2935 = dma.done.wait (%p2475_p8), %s2181_s11, 4096  }
 0x531   : > { %2937 = vsyncadd (%p2475_p8), %s2181_s11, 4294963200  ;;  %s4203_s15 = sld [smem:[#allocation8_spill]]  ;;  %p20_p9 = scmp.ge.s32.totalorder %s3027_s30, 6  }
 0x532   : > { %s4204_s24 = smov %s2944_s25  ;;  %s4205_s25 = smov %s2948_s26 }
 0x533   : > { %s4207_s27 = smov %s3027_s30  ;;  %22 = sbr.rel (!%p20_p9) target bundleno = 5 (0x5), region = 93 }
 0x537   : > { %s4206_s26 = smov %s4203_s15 }
 0x538   :  { %2187 = vsyncpa [#allocation3], 1 }
 0x539   :  { %2189 = vsyncpa [#allocation3 + $0x1], 1 }
 0x53a   :  { %2190 = vsyncpa [#allocation4], 1 }
 0x53b   :  { %2192 = vsyncpa [#allocation4 + $0x1], 1 }

</bundles_post_ra>
